<compile_context>
chip_gen: v7x
topology: tpu7x:2x2x1
jax: 0.10.0
libtpu: 0.0.40
codegen_flags: <defaults>
</compile_context>

<pallas_src>
import jax
import jax.numpy as jnp
from jax.experimental import pallas as pl
from jax.experimental.pallas import tpu as pltpu

# ---------------------------------------------------------------------------
# Config (mirrors opt.args of ACPredGRU) — small, deterministic, synthetic.
# ---------------------------------------------------------------------------
MAX_DICT_LEN = 40          # opt.args['MaxDictLength']
FP_SIZE      = 32          # opt.args['FPSize']
GRU_LAYERS   = 2           # opt.args['GRULayers']   (kernel assumes 2)
DNN_LAYERS   = (64, 32)    # opt.args['DNNLayers']   (kernel assumes 2 hidden layers)
OUTPUT_SIZE  = 2           # opt.args['OutputSize']
PAD_IDX      = MAX_DICT_LEN - 1

BATCH   = 2
SEQ_LEN = 8

H  = FP_SIZE               # GRU hidden size == FPSize
V  = MAX_DICT_LEN
L  = SEQ_LEN
BP = 8                     # sublane-padded combined batch (mol1, mol2, pad, mol2-dup)
G  = 6 * H                 # fused gate width [r_f|r_b|z_f|z_b|n_f|n_b]

assert GRU_LAYERS == 2 and DNN_LAYERS == (2 * H, 32) and OUTPUT_SIZE <= 2 * H
assert 2 * BATCH <= BP and (BP == 2 * BATCH or 3 * BATCH <= BP)

# Row offsets inside the single bf16 weight slab (all multiples of 16 so every
# segment load is bf16-tile aligned).
R_E0   = 0                       # (2V, G)  one-hot weight: emb @ W_ih_l0 + gi biases
R_WHH0 = 2 * V                   # (2H, G)  layer-0 W_hh (both directions)
R_W1   = R_WHH0 + 2 * H          # (4H, G)  layer-1 W_ih (both directions, slab order)
R_WHH1 = R_W1 + 4 * H            # (2H, G)  layer-1 W_hh
R_D1   = R_WHH1 + 2 * H          # (2H, 2H) DNN layer 1
R_D2   = R_D1 + 2 * H            # (2H, 2H) DNN layer 2 (cols >=32 zero)
R_D3   = R_D2 + 2 * H            # (2H, 2H) DNN layer 3 (rows >=32, cols >=2 zero)
W_ROWS = R_D3 + 2 * H
assert all(r % 16 == 0 for r in (R_WHH0, R_W1, R_WHH1, R_D1, R_D2, R_D3, W_ROWS))

# Row indices inside the f32 bias slab (8, G).
B_GI1, B_HN0, B_HN1, B_DB1, B_DB2, B_DB3 = 0, 1, 2, 3, 4, 5
B_ROWS = 8


# ---------------------------------------------------------------------------
# Fused forward kernel (single pallas_call for the whole model).
# ---------------------------------------------------------------------------
def _acpredgru_kernel(tok_ref, w_ref, b_ref, out_ref, slab_ref):
    f32, bf16 = jnp.float32, jnp.bfloat16

    # ---- One-hot over a doubled vocab: cols [0,V) select x(t) (forward
    #      stream), cols [V,2V) select x(L-1-t) (backward stream).  Embedding,
    #      layer-0 W_ih and every gi-side bias are pre-folded host-side into
    #      w_ref rows [0,2V), so one MXU push yields the input-side gate
    #      pre-activations of ALL timesteps and BOTH directions.
    tok = tok_ref[...]                                               # (L*BP, 2) int32
    iota = jax.lax.broadcasted_iota(jnp.int32, (L * BP, 2 * V), 1)
    hit = (iota == tok[:, 0:1]) | (iota == tok[:, 1:2])
    onehot2 = jnp.where(hit, 1.0, 0.0).astype(bf16)                  # (L*BP, 2V)
    gi0 = jnp.dot(onehot2, w_ref[R_E0:R_E0 + 2 * V, :],
                  preferred_element_type=f32)                        # (L*BP, 6H)

    def run_layer(gi_all, whh, bhn, store_to_slab):
        # h holds BOTH directions: cols [0,H) = forward state (time s),
        # cols [H,2H) = backward state (time L-1-s).
        h = jnp.zeros((BP, 2 * H), f32)
        for s in range(L):                                  # fully unrolled
            gi = gi_all[s * BP:(s + 1) * BP, :]                      # (BP, 6H)
            gh = jnp.dot(h.astype(bf16), whh, preferred_element_type=f32)
            rz = jax.nn.sigmoid(gi[:, 0:4 * H] + gh[:, 0:4 * H])     # one 128-lane sigmoid
            r, z = rz[:, 0:2 * H], rz[:, 2 * H:4 * H]
            n = jnp.tanh(gi[:, 4 * H:6 * H] + r * (gh[:, 4 * H:6 * H] + bhn))
            h = (1.0 - z) * n + z * h
            if store_to_slab:
                # Layer-output slab, row block t has column layout
                #   [h_f(t) | h_b(L-1-t) | h_f(L-1-t) | h_b(t)]
                # which matches the row ordering of the fused layer-1 W_ih,
                # so each step needs only two contiguous 64-lane stores.
                slab_ref[s * BP:(s + 1) * BP, 0:2 * H] = h
                slab_ref[(L - 1 - s) * BP:(L - s) * BP, 2 * H:4 * H] = h
        return h                     # = [h_f(L-1) | h_b(0)]  (final hiddens, both dirs)

    # ---- Layer 0 ------------------------------------------------------------
    whh0 = w_ref[R_WHH0:R_WHH0 + 2 * H, :]
    bhn0 = jnp.broadcast_to(b_ref[B_HN0:B_HN0 + 1, 0:2 * H], (BP, 2 * H))
    h0 = run_layer(gi0, whh0, bhn0, True)

    # ---- Layer 1: input-side projections in ONE matmul from the slab --------
    x1 = slab_ref[...].astype(bf16)                                   # (L*BP, 4H)
    gi1 = (jnp.dot(x1, w_ref[R_W1:R_W1 + 4 * H, :], preferred_element_type=f32)
           + b_ref[B_GI1:B_GI1 + 1, :])                               # one hoisted bias add
    whh1 = w_ref[R_WHH1:R_WHH1 + 2 * H, :]
    bhn1 = jnp.broadcast_to(b_ref[B_HN1:B_HN1 + 1, 0:2 * H], (BP, 2 * H))
    h1 = run_layer(gi1, whh1, bhn1, False)

    # ---- h_n sum over layers * directions ------------------------------------
    hsum = h0 + h1
    feat = hsum[:, 0:H] + hsum[:, H:2 * H]                            # (BP, H)

    # ---- Pairwise feature via a sublane roll (XLU, off the MXU).  Molecule-2
    #      rows are duplicated at rows [BP-BATCH, BP), so rows [0,BATCH) of the
    #      rolled array hold molecule-2 features under either roll convention.
    feat2 = pltpu.roll(feat, shift=BP - BATCH, axis=0)
    pair = jnp.concatenate([feat, feat2], axis=1).astype(bf16)        # (BP, 2H)

    # ---- DNN head: Linear+ReLU, Linear+ReLU, Linear (dropout = identity) -----
    d1 = w_ref[R_D1:R_D1 + 2 * H, 0:2 * H]
    d2 = w_ref[R_D2:R_D2 + 2 * H, 0:2 * H]
    d3 = w_ref[R_D3:R_D3 + 2 * H, 0:2 * H]
    a1 = jnp.maximum(jnp.dot(pair, d1, preferred_element_type=f32)
                     + b_ref[B_DB1:B_DB1 + 1, 0:2 * H], 0.0)
    a2 = jnp.maximum(jnp.dot(a1.astype(bf16), d2, preferred_element_type=f32)
                     + b_ref[B_DB2:B_DB2 + 1, 0:2 * H], 0.0)
    out_ref[...] = (jnp.dot(a2.astype(bf16), d3, preferred_element_type=f32)
                    + b_ref[B_DB3:B_DB3 + 1, 0:2 * H])                # cols >= OUTPUT_SIZE are 0


# ---------------------------------------------------------------------------
# Host-side weight fusion: build ONE bf16 weight slab + ONE f32 bias slab.
# Gate column layout everywhere: [r_f | r_b | z_f | z_b | n_f | n_b].
# ---------------------------------------------------------------------------
def _place(m, d):
    """m: (rows, 3H) with cols [r|z|n] for direction d -> (rows, 6H)."""
    rows = m.shape[0]
    out = jnp.zeros((rows, G), jnp.float32)
    out = out.at[:, d * H:(d + 1) * H].set(m[:, 0:H])
    out = out.at[:, 2 * H + d * H:2 * H + (d + 1) * H].set(m[:, H:2 * H])
    out = out.at[:, 4 * H + d * H:4 * H + (d + 1) * H].set(m[:, 2 * H:3 * H])
    return out


def _gi_bias(b_ih, b_hh):
    """Input-side gate bias: r,z get b_ih+b_hh (fully folded), n gets b_ih only."""
    return jnp.concatenate([b_ih[:, 0:2 * H] + b_hh[:, 0:2 * H], b_ih[:, 2 * H:]], axis=1)


def _pad_cols(x, width):
    return jnp.pad(x, ((0, 0), (0, width - x.shape[1])))


def _fuse_params(params):
    emb = params["embedding"]
    (wif0, whf0, bif0, bhf0), (wib0, whb0, bib0, bhb0) = params["gru"][0]
    (wif1, whf1, bif1, bhf1), (wib1, whb1, bib1, bhb1) = params["gru"][1]

    # Layer 0: embedding and all gi-side biases folded into the one-hot weight.
    e0 = jnp.concatenate(
        [_place(emb @ wif0, 0) + _place(_gi_bias(bif0, bhf0), 0),
         _place(emb @ wib0, 1) + _place(_gi_bias(bib0, bhb0), 1)], axis=0)   # (2V, G)
    whh0 = jnp.concatenate([_place(whf0, 0), _place(whb0, 1)], axis=0)       # (2H, G)
    bhn0 = jnp.concatenate([bhf0[:, 2 * H:], bhb0[:, 2 * H:]], axis=1)       # (1, 2H)

    # Layer 1: rows ordered like the slab columns [h_f(s)|h_b(L-1-s)|h_f(L-1-s)|h_b(s)].
    w1 = jnp.concatenate(
        [_place(wif1[0:H, :], 0), _place(wib1[H:2 * H, :], 1),
         _place(wib1[0:H, :], 1), _place(wif1[H:2 * H, :], 0)], axis=0)      # (4H, G)
    b1 = _place(_gi_bias(bif1, bhf1), 0) + _place(_gi_bias(bib1, bhb1), 1)   # (1, G)
    whh1 = jnp.concatenate([_place(whf1, 0), _place(whb1, 1)], axis=0)
    bhn1 = jnp.concatenate([bhf1[:, 2 * H:], bhb1[:, 2 * H:]], axis=1)

    (dw1, db1), (dw2, db2), (dw3, db3) = params["dnn"]
    d1p = dw1                                                                # (2H, 2H)
    d2p = _pad_cols(dw2, 2 * H)                                              # (2H, 2H)
    d3p = jnp.pad(dw3, ((0, 2 * H - dw3.shape[0]), (0, 2 * H - dw3.shape[1])))

    wslab = jnp.concatenate(
        [e0, whh0, w1, whh1,
         _pad_cols(d1p, G), _pad_cols(d2p, G), _pad_cols(d3p, G)],
        axis=0).astype(jnp.bfloat16)                                         # (528, G)

    bslab = jnp.concatenate(
        [b1, _pad_cols(bhn0, G), _pad_cols(bhn1, G),
         _pad_cols(db1, G), _pad_cols(db2, G), _pad_cols(db3, G),
         jnp.zeros((B_ROWS - 6, G), jnp.float32)], axis=0)                   # (8, G)
    return wslab, bslab


# ---------------------------------------------------------------------------
# Wrapper: single pallas_call for the full ACPredGRU forward.
# ---------------------------------------------------------------------------
def ac_pred_gru_forward(tokens1, tokens2, params):
    assert tokens1.shape == (BATCH, SEQ_LEN) and tokens2.shape == (BATCH, SEQ_LEN)

    # Combined, sublane-padded batch: rows [0,B)=mol1, [B,2B)=mol2, middle=PAD,
    # rows [BP-B,BP)=mol2 duplicate (makes the pairing roll direction-agnostic).
    tok_comb = jnp.full((BP, SEQ_LEN), PAD_IDX, jnp.int32)
    tok_comb = tok_comb.at[0:BATCH].set(tokens1)
    tok_comb = tok_comb.at[BATCH:2 * BATCH].set(tokens2)
    tok_comb = tok_comb.at[BP - BATCH:BP].set(tokens2)

    tok_f = jnp.transpose(tok_comb, (1, 0)).reshape(L * BP)            # token at time s
    tok_b = jnp.transpose(tok_comb[:, ::-1], (1, 0)).reshape(L * BP)   # token at time L-1-s
    tok2 = jnp.stack([tok_f, tok_b + V], axis=1).astype(jnp.int32)     # (L*BP, 2)

    wslab, bslab = _fuse_params(params)

    out_full = pl.pallas_call(
        _acpredgru_kernel,
        out_shape=jax.ShapeDtypeStruct((BP, 2 * H), jnp.float32),
        grid_spec=pltpu.PrefetchScalarGridSpec(
            num_scalar_prefetch=0,
            grid=(1,),
            in_specs=[pl.BlockSpec(tok2.shape, lambda i: (0, 0)),
                      pl.BlockSpec(wslab.shape, lambda i: (0, 0)),
                      pl.BlockSpec(bslab.shape, lambda i: (0, 0))],
            out_specs=pl.BlockSpec((BP, 2 * H), lambda i: (0, 0)),
            scratch_shapes=[pltpu.VMEM((L * BP, 4 * H), jnp.float32)],
        ),
        compiler_params=pltpu.CompilerParams(dimension_semantics=("arbitrary",)),
    )(tok2, wslab, bslab)
    return out_full[:BATCH, :OUTPUT_SIZE]      # rows >= BATCH / cols >= OUTPUT_SIZE are padding


# ---------------------------------------------------------------------------
# Deterministic parameter init (shapes follow the PyTorch module's __init__).
# ---------------------------------------------------------------------------
def _uniform(key, shape, scale):
    return jax.random.uniform(key, shape, jnp.float32, -scale, scale)


def init_params(key):
    keys = iter(jax.random.split(key, 64))
    emb = jax.random.normal(next(keys), (MAX_DICT_LEN, FP_SIZE), jnp.float32)
    emb = emb.at[PAD_IDX].set(0.0)                  # padding_idx row -> zeros

    s = 1.0 / float(H) ** 0.5
    gru = []
    for layer in range(GRU_LAYERS):
        d_in = FP_SIZE if layer == 0 else 2 * FP_SIZE
        dirs = []
        for _direction in range(2):                 # forward, backward
            w_ih_t = _uniform(next(keys), (d_in, 3 * H), s)   # W_ih^T, gates [r|z|n]
            w_hh_t = _uniform(next(keys), (H, 3 * H), s)
            b_ih = _uniform(next(keys), (1, 3 * H), s)
            b_hh = _uniform(next(keys), (1, 3 * H), s)
            dirs.append((w_ih_t, w_hh_t, b_ih, b_hh))
        gru.append(tuple(dirs))

    dims = (2 * FP_SIZE,) + DNN_LAYERS + (OUTPUT_SIZE,)
    dnn = []
    for i in range(len(dims) - 1):
        sc = 1.0 / float(dims[i]) ** 0.5
        w = _uniform(next(keys), (dims[i], dims[i + 1]), sc)
        b = _uniform(next(keys), (1, dims[i + 1]), sc)
        dnn.append((w, b))

    return {"embedding": emb, "gru": tuple(gru), "dnn": tuple(dnn)}


# ---------------------------------------------------------------------------
# Pure-JAX reference (uses the RAW per-direction weights, so it also validates
# the host-side fusion / embedding folding / slab layouts).
# ---------------------------------------------------------------------------
def _gru_dir_ref(x_tbd, w_ih_t, w_hh_t, b_ih, b_hh):
    def step(h, x_t):
        gi = x_t @ w_ih_t + b_ih
        gh = h @ w_hh_t + b_hh
        r = jax.nn.sigmoid(gi[:, :H] + gh[:, :H])
        z = jax.nn.sigmoid(gi[:, H:2 * H] + gh[:, H:2 * H])
        n = jnp.tanh(gi[:, 2 * H:] + r * gh[:, 2 * H:])
        h_new = (1.0 - z) * n + z * h
        return h_new, h_new

    h0 = jnp.zeros((x_tbd.shape[1], H), jnp.float32)
    hlast, hseq = jax.lax.scan(step, h0, x_tbd)
    return hseq, hlast


def forward_ref(tokens1, tokens2, params):
    emb = params["embedding"]

    def mol_feature(tokens):
        x = jnp.transpose(emb[tokens], (1, 0, 2))   # (L, B, FP)
        hsum = jnp.zeros((tokens.shape[0], FP_SIZE), jnp.float32)
        inp = x
        for (fwd, bwd) in params["gru"]:
            hseq_f, hlast_f = _gru_dir_ref(inp, *fwd)
            hseq_b_rev, hlast_b = _gru_dir_ref(inp[::-1], *bwd)
            hsum = hsum + hlast_f + hlast_b
            inp = jnp.concatenate([hseq_f, hseq_b_rev[::-1]], axis=-1)
        return hsum

    pair = jnp.concatenate([mol_feature(tokens1), mol_feature(tokens2)], axis=1)
    (w1, b1), (w2, b2), (w3, b3) = params["dnn"]
    h = jnp.maximum(pair @ w1 + b1, 0.0)
    h = jnp.maximum(h @ w2 + b2, 0.0)
    return h @ w3 + b3


# ---------------------------------------------------------------------------
if __name__ == "__main__":
    key = jax.random.PRNGKey(0)
    pkey, tkey1, tkey2 = jax.random.split(key, 3)
    params = init_params(pkey)

    tokens1 = jax.random.randint(tkey1, (BATCH, SEQ_LEN), 0, MAX_DICT_LEN, dtype=jnp.int32)
    tokens2 = jax.random.randint(tkey2, (BATCH, SEQ_LEN), 0, MAX_DICT_LEN, dtype=jnp.int32)

    out = jax.jit(ac_pred_gru_forward)(tokens1, tokens2, params)
    out = jax.block_until_ready(out)
    assert out.shape == (BATCH, OUTPUT_SIZE)

    ref = forward_ref(tokens1, tokens2, params)
    # bf16 MXU operands compound a little rounding across the 16-step recurrence,
    # so the tolerance is slightly looser than the pure-f32 version's 1e-2.
    if not bool(jnp.allclose(out, ref, atol=2e-2, rtol=2e-2)):
        raise AssertionError("Pallas output does not match reference")

    print("KERNEL_OK")
</pallas_src>

<mosaic_0001>
module attributes {stable_mosaic.version = 11 : i64} {
  func.func @_acpredgru_kernel(%arg0: i32, %arg1: memref<64x2xi32, #tpu.memory_space<vmem>>, %arg2: memref<528x192xbf16, #tpu.memory_space<vmem>>, %arg3: memref<8x192xf32, #tpu.memory_space<vmem>>, %arg4: memref<8x64xf32, #tpu.memory_space<vmem>>, %arg5: memref<64x128xf32, #tpu.memory_space<vmem>>) attributes {dimension_semantics = [#tpu.dimension_semantics<arbitrary>], iteration_bounds = array<i64: 1>, scalar_prefetch = 0 : i64, scratch_operands = 1 : i64, tpu.core_type = #tpu.core_type<tc>, window_params = [{pipeline_mode = #tpu.pipeline_mode<synchronous>, transform_indices = @transform_0, window_bounds = array<i64: 64, 2>}, {pipeline_mode = #tpu.pipeline_mode<synchronous>, transform_indices = @transform_1, window_bounds = array<i64: 528, 192>}, {pipeline_mode = #tpu.pipeline_mode<synchronous>, transform_indices = @transform_2, window_bounds = array<i64: 8, 192>}, {pipeline_mode = #tpu.pipeline_mode<synchronous>, transform_indices = @transform_3, window_bounds = array<i64: 8, 64>}]} {
    %c0 = arith.constant 0 : index
    %c0_0 = arith.constant 0 : index
    %0 = vector.load %arg1[%c0, %c0_0] : memref<64x2xi32, #tpu.memory_space<vmem>>, vector<64x2xi32>
    %1 = tpu.iota {dimensions = array<i32: 1>} : vector<64x80xi32>
    %2 = vector.extract_strided_slice %0 {offsets = [0, 0], sizes = [64, 1], strides = [1, 1]} : vector<64x2xi32> to vector<64x1xi32>
    %3 = vector.broadcast %2 : vector<64x1xi32> to vector<64x80xi32>
    %4 = arith.cmpi eq, %1, %3 : vector<64x80xi32>
    %5 = vector.extract_strided_slice %0 {offsets = [0, 1], sizes = [64, 1], strides = [1, 1]} : vector<64x2xi32> to vector<64x1xi32>
    %6 = vector.broadcast %5 : vector<64x1xi32> to vector<64x80xi32>
    %7 = arith.cmpi eq, %1, %6 : vector<64x80xi32>
    %8 = arith.ori %4, %7 : vector<64x80xi1>
    %cst = arith.constant 1.000000e+00 : f32
    %cst_1 = arith.constant 0.000000e+00 : f32
    %9 = vector.broadcast %cst : f32 to vector<64x80xf32>
    %10 = vector.broadcast %cst_1 : f32 to vector<64x80xf32>
    %11 = arith.select %8, %9, %10 : vector<64x80xi1>, vector<64x80xf32>
    %12 = arith.truncf %11 : vector<64x80xf32> to vector<64x80xbf16>
    %c0_2 = arith.constant 0 : index
    %c0_3 = arith.constant 0 : index
    %13 = vector.load %arg2[%c0_2, %c0_3] : memref<528x192xbf16, #tpu.memory_space<vmem>>, vector<80x192xbf16>
    %cst_4 = arith.constant dense<0.000000e+00> : vector<64x192xf32>
    %14 = tpu.matmul %12, %13, %cst_4 {dimension_numbers = #tpu.dot_dimension_numbers<[1], [0], [0], [1], [0, 0, 1, 1], [], []>} : vector<64x80xbf16>, vector<80x192xbf16>, vector<64x192xf32> -> vector<64x192xf32>
    %c80 = arith.constant 80 : index
    %c0_5 = arith.constant 0 : index
    %15 = vector.load %arg2[%c80, %c0_5] : memref<528x192xbf16, #tpu.memory_space<vmem>>, vector<64x192xbf16>
    %c1 = arith.constant 1 : index
    %c0_6 = arith.constant 0 : index
    %16 = vector.load %arg3[%c1, %c0_6] : memref<8x192xf32, #tpu.memory_space<vmem>>, vector<1x64xf32>
    %17 = vector.shape_cast %16 : vector<1x64xf32> to vector<1x64xf32>
    %18 = vector.broadcast %17 : vector<1x64xf32> to vector<8x64xf32>
    %cst_7 = arith.constant 0.000000e+00 : f32
    %19 = vector.broadcast %cst_7 : f32 to vector<8x64xf32>
    %20 = vector.extract_strided_slice %14 {offsets = [0, 0], sizes = [8, 192], strides = [1, 1]} : vector<64x192xf32> to vector<8x192xf32>
    %21 = arith.truncf %19 : vector<8x64xf32> to vector<8x64xbf16>
    %cst_8 = arith.constant dense<0.000000e+00> : vector<8x192xf32>
    %22 = tpu.matmul %21, %15, %cst_8 {dimension_numbers = #tpu.dot_dimension_numbers<[1], [0], [0], [1], [0, 0, 1, 1], [], []>} : vector<8x64xbf16>, vector<64x192xbf16>, vector<8x192xf32> -> vector<8x192xf32>
    %23 = vector.extract_strided_slice %20 {offsets = [0, 0], sizes = [8, 128], strides = [1, 1]} : vector<8x192xf32> to vector<8x128xf32>
    %24 = vector.extract_strided_slice %22 {offsets = [0, 0], sizes = [8, 128], strides = [1, 1]} : vector<8x192xf32> to vector<8x128xf32>
    %25 = arith.addf %23, %24 : vector<8x128xf32>
    %26 = arith.negf %25 : vector<8x128xf32>
    %27 = math.exp %26 : vector<8x128xf32>
    %cst_9 = arith.constant 1.000000e+00 : f32
    %28 = vector.broadcast %cst_9 : f32 to vector<8x128xf32>
    %29 = arith.addf %28, %27 : vector<8x128xf32>
    %30 = arith.divf %28, %29 : vector<8x128xf32>
    %31 = vector.extract_strided_slice %30 {offsets = [0, 0], sizes = [8, 64], strides = [1, 1]} : vector<8x128xf32> to vector<8x64xf32>
    %32 = vector.extract_strided_slice %30 {offsets = [0, 64], sizes = [8, 64], strides = [1, 1]} : vector<8x128xf32> to vector<8x64xf32>
    %33 = vector.extract_strided_slice %20 {offsets = [0, 128], sizes = [8, 64], strides = [1, 1]} : vector<8x192xf32> to vector<8x64xf32>
    %34 = vector.extract_strided_slice %22 {offsets = [0, 128], sizes = [8, 64], strides = [1, 1]} : vector<8x192xf32> to vector<8x64xf32>
    %35 = arith.addf %34, %18 : vector<8x64xf32>
    %36 = arith.mulf %31, %35 : vector<8x64xf32>
    %37 = arith.addf %33, %36 : vector<8x64xf32>
    %38 = math.tanh %37 : vector<8x64xf32>
    %cst_10 = arith.constant 1.000000e+00 : f32
    %39 = vector.broadcast %cst_10 : f32 to vector<8x64xf32>
    %40 = arith.subf %39, %32 : vector<8x64xf32>
    %41 = arith.mulf %40, %38 : vector<8x64xf32>
    %42 = arith.mulf %32, %19 : vector<8x64xf32>
    %43 = arith.addf %41, %42 : vector<8x64xf32>
    %c0_11 = arith.constant 0 : index
    %c0_12 = arith.constant 0 : index
    %44 = vector.load %arg5[%c0_11, %c0_12] : memref<64x128xf32, #tpu.memory_space<vmem>>, vector<8x64xf32>
    tpu.vector_store %arg5[%c0_11, %c0_12], %43 {strides = array<i32>} : memref<64x128xf32, #tpu.memory_space<vmem>>, vector<8x64xf32>,
    %c56 = arith.constant 56 : index
    %c64 = arith.constant 64 : index
    %45 = vector.load %arg5[%c56, %c64] : memref<64x128xf32, #tpu.memory_space<vmem>>, vector<8x64xf32>
    tpu.vector_store %arg5[%c56, %c64], %43 {strides = array<i32>} : memref<64x128xf32, #tpu.memory_space<vmem>>, vector<8x64xf32>,
    %46 = vector.extract_strided_slice %14 {offsets = [8, 0], sizes = [8, 192], strides = [1, 1]} : vector<64x192xf32> to vector<8x192xf32>
    %47 = arith.truncf %43 : vector<8x64xf32> to vector<8x64xbf16>
    %cst_13 = arith.constant dense<0.000000e+00> : vector<8x192xf32>
    %48 = tpu.matmul %47, %15, %cst_13 {dimension_numbers = #tpu.dot_dimension_numbers<[1], [0], [0], [1], [0, 0, 1, 1], [], []>} : vector<8x64xbf16>, vector<64x192xbf16>, vector<8x192xf32> -> vector<8x192xf32>
    %49 = vector.extract_strided_slice %46 {offsets = [0, 0], sizes = [8, 128], strides = [1, 1]} : vector<8x192xf32> to vector<8x128xf32>
    %50 = vector.extract_strided_slice %48 {offsets = [0, 0], sizes = [8, 128], strides = [1, 1]} : vector<8x192xf32> to vector<8x128xf32>
    %51 = arith.addf %49, %50 : vector<8x128xf32>
    %52 = arith.negf %51 : vector<8x128xf32>
    %53 = math.exp %52 : vector<8x128xf32>
    %cst_14 = arith.constant 1.000000e+00 : f32
    %54 = vector.broadcast %cst_14 : f32 to vector<8x128xf32>
    %55 = arith.addf %54, %53 : vector<8x128xf32>
    %56 = arith.divf %54, %55 : vector<8x128xf32>
    %57 = vector.extract_strided_slice %56 {offsets = [0, 0], sizes = [8, 64], strides = [1, 1]} : vector<8x128xf32> to vector<8x64xf32>
    %58 = vector.extract_strided_slice %56 {offsets = [0, 64], sizes = [8, 64], strides = [1, 1]} : vector<8x128xf32> to vector<8x64xf32>
    %59 = vector.extract_strided_slice %46 {offsets = [0, 128], sizes = [8, 64], strides = [1, 1]} : vector<8x192xf32> to vector<8x64xf32>
    %60 = vector.extract_strided_slice %48 {offsets = [0, 128], sizes = [8, 64], strides = [1, 1]} : vector<8x192xf32> to vector<8x64xf32>
    %61 = arith.addf %60, %18 : vector<8x64xf32>
    %62 = arith.mulf %57, %61 : vector<8x64xf32>
    %63 = arith.addf %59, %62 : vector<8x64xf32>
    %64 = math.tanh %63 : vector<8x64xf32>
    %cst_15 = arith.constant 1.000000e+00 : f32
    %65 = vector.broadcast %cst_15 : f32 to vector<8x64xf32>
    %66 = arith.subf %65, %58 : vector<8x64xf32>
    %67 = arith.mulf %66, %64 : vector<8x64xf32>
    %68 = arith.mulf %58, %43 : vector<8x64xf32>
    %69 = arith.addf %67, %68 : vector<8x64xf32>
    %c8 = arith.constant 8 : index
    %c0_16 = arith.constant 0 : index
    %70 = vector.load %arg5[%c8, %c0_16] : memref<64x128xf32, #tpu.memory_space<vmem>>, vector<8x64xf32>
    tpu.vector_store %arg5[%c8, %c0_16], %69 {strides = array<i32>} : memref<64x128xf32, #tpu.memory_space<vmem>>, vector<8x64xf32>,
    %c48 = arith.constant 48 : index
    %c64_17 = arith.constant 64 : index
    %71 = vector.load %arg5[%c48, %c64_17] : memref<64x128xf32, #tpu.memory_space<vmem>>, vector<8x64xf32>
    tpu.vector_store %arg5[%c48, %c64_17], %69 {strides = array<i32>} : memref<64x128xf32, #tpu.memory_space<vmem>>, vector<8x64xf32>,
    %72 = vector.extract_strided_slice %14 {offsets = [16, 0], sizes = [8, 192], strides = [1, 1]} : vector<64x192xf32> to vector<8x192xf32>
    %73 = arith.truncf %69 : vector<8x64xf32> to vector<8x64xbf16>
    %cst_18 = arith.constant dense<0.000000e+00> : vector<8x192xf32>
    %74 = tpu.matmul %73, %15, %cst_18 {dimension_numbers = #tpu.dot_dimension_numbers<[1], [0], [0], [1], [0, 0, 1, 1], [], []>} : vector<8x64xbf16>, vector<64x192xbf16>, vector<8x192xf32> -> vector<8x192xf32>
    %75 = vector.extract_strided_slice %72 {offsets = [0, 0], sizes = [8, 128], strides = [1, 1]} : vector<8x192xf32> to vector<8x128xf32>
    %76 = vector.extract_strided_slice %74 {offsets = [0, 0], sizes = [8, 128], strides = [1, 1]} : vector<8x192xf32> to vector<8x128xf32>
    %77 = arith.addf %75, %76 : vector<8x128xf32>
    %78 = arith.negf %77 : vector<8x128xf32>
    %79 = math.exp %78 : vector<8x128xf32>
    %cst_19 = arith.constant 1.000000e+00 : f32
    %80 = vector.broadcast %cst_19 : f32 to vector<8x128xf32>
    %81 = arith.addf %80, %79 : vector<8x128xf32>
    %82 = arith.divf %80, %81 : vector<8x128xf32>
    %83 = vector.extract_strided_slice %82 {offsets = [0, 0], sizes = [8, 64], strides = [1, 1]} : vector<8x128xf32> to vector<8x64xf32>
    %84 = vector.extract_strided_slice %82 {offsets = [0, 64], sizes = [8, 64], strides = [1, 1]} : vector<8x128xf32> to vector<8x64xf32>
    %85 = vector.extract_strided_slice %72 {offsets = [0, 128], sizes = [8, 64], strides = [1, 1]} : vector<8x192xf32> to vector<8x64xf32>
    %86 = vector.extract_strided_slice %74 {offsets = [0, 128], sizes = [8, 64], strides = [1, 1]} : vector<8x192xf32> to vector<8x64xf32>
    %87 = arith.addf %86, %18 : vector<8x64xf32>
    %88 = arith.mulf %83, %87 : vector<8x64xf32>
    %89 = arith.addf %85, %88 : vector<8x64xf32>
    %90 = math.tanh %89 : vector<8x64xf32>
    %cst_20 = arith.constant 1.000000e+00 : f32
    %91 = vector.broadcast %cst_20 : f32 to vector<8x64xf32>
    %92 = arith.subf %91, %84 : vector<8x64xf32>
    %93 = arith.mulf %92, %90 : vector<8x64xf32>
    %94 = arith.mulf %84, %69 : vector<8x64xf32>
    %95 = arith.addf %93, %94 : vector<8x64xf32>
    %c16 = arith.constant 16 : index
    %c0_21 = arith.constant 0 : index
    %96 = vector.load %arg5[%c16, %c0_21] : memref<64x128xf32, #tpu.memory_space<vmem>>, vector<8x64xf32>
    tpu.vector_store %arg5[%c16, %c0_21], %95 {strides = array<i32>} : memref<64x128xf32, #tpu.memory_space<vmem>>, vector<8x64xf32>,
    %c40 = arith.constant 40 : index
    %c64_22 = arith.constant 64 : index
    %97 = vector.load %arg5[%c40, %c64_22] : memref<64x128xf32, #tpu.memory_space<vmem>>, vector<8x64xf32>
    tpu.vector_store %arg5[%c40, %c64_22], %95 {strides = array<i32>} : memref<64x128xf32, #tpu.memory_space<vmem>>, vector<8x64xf32>,
    %98 = vector.extract_strided_slice %14 {offsets = [24, 0], sizes = [8, 192], strides = [1, 1]} : vector<64x192xf32> to vector<8x192xf32>
    %99 = arith.truncf %95 : vector<8x64xf32> to vector<8x64xbf16>
    %cst_23 = arith.constant dense<0.000000e+00> : vector<8x192xf32>
    %100 = tpu.matmul %99, %15, %cst_23 {dimension_numbers = #tpu.dot_dimension_numbers<[1], [0], [0], [1], [0, 0, 1, 1], [], []>} : vector<8x64xbf16>, vector<64x192xbf16>, vector<8x192xf32> -> vector<8x192xf32>
    %101 = vector.extract_strided_slice %98 {offsets = [0, 0], sizes = [8, 128], strides = [1, 1]} : vector<8x192xf32> to vector<8x128xf32>
    %102 = vector.extract_strided_slice %100 {offsets = [0, 0], sizes = [8, 128], strides = [1, 1]} : vector<8x192xf32> to vector<8x128xf32>
    %103 = arith.addf %101, %102 : vector<8x128xf32>
    %104 = arith.negf %103 : vector<8x128xf32>
    %105 = math.exp %104 : vector<8x128xf32>
    %cst_24 = arith.constant 1.000000e+00 : f32
    %106 = vector.broadcast %cst_24 : f32 to vector<8x128xf32>
    %107 = arith.addf %106, %105 : vector<8x128xf32>
    %108 = arith.divf %106, %107 : vector<8x128xf32>
    %109 = vector.extract_strided_slice %108 {offsets = [0, 0], sizes = [8, 64], strides = [1, 1]} : vector<8x128xf32> to vector<8x64xf32>
    %110 = vector.extract_strided_slice %108 {offsets = [0, 64], sizes = [8, 64], strides = [1, 1]} : vector<8x128xf32> to vector<8x64xf32>
    %111 = vector.extract_strided_slice %98 {offsets = [0, 128], sizes = [8, 64], strides = [1, 1]} : vector<8x192xf32> to vector<8x64xf32>
    %112 = vector.extract_strided_slice %100 {offsets = [0, 128], sizes = [8, 64], strides = [1, 1]} : vector<8x192xf32> to vector<8x64xf32>
    %113 = arith.addf %112, %18 : vector<8x64xf32>
    %114 = arith.mulf %109, %113 : vector<8x64xf32>
    %115 = arith.addf %111, %114 : vector<8x64xf32>
    %116 = math.tanh %115 : vector<8x64xf32>
    %cst_25 = arith.constant 1.000000e+00 : f32
    %117 = vector.broadcast %cst_25 : f32 to vector<8x64xf32>
    %118 = arith.subf %117, %110 : vector<8x64xf32>
    %119 = arith.mulf %118, %116 : vector<8x64xf32>
    %120 = arith.mulf %110, %95 : vector<8x64xf32>
    %121 = arith.addf %119, %120 : vector<8x64xf32>
    %c24 = arith.constant 24 : index
    %c0_26 = arith.constant 0 : index
    %122 = vector.load %arg5[%c24, %c0_26] : memref<64x128xf32, #tpu.memory_space<vmem>>, vector<8x64xf32>
    tpu.vector_store %arg5[%c24, %c0_26], %121 {strides = array<i32>} : memref<64x128xf32, #tpu.memory_space<vmem>>, vector<8x64xf32>,
    %c32 = arith.constant 32 : index
    %c64_27 = arith.constant 64 : index
    %123 = vector.load %arg5[%c32, %c64_27] : memref<64x128xf32, #tpu.memory_space<vmem>>, vector<8x64xf32>
    tpu.vector_store %arg5[%c32, %c64_27], %121 {strides = array<i32>} : memref<64x128xf32, #tpu.memory_space<vmem>>, vector<8x64xf32>,
    %124 = vector.extract_strided_slice %14 {offsets = [32, 0], sizes = [8, 192], strides = [1, 1]} : vector<64x192xf32> to vector<8x192xf32>
    %125 = arith.truncf %121 : vector<8x64xf32> to vector<8x64xbf16>
    %cst_28 = arith.constant dense<0.000000e+00> : vector<8x192xf32>
    %126 = tpu.matmul %125, %15, %cst_28 {dimension_numbers = #tpu.dot_dimension_numbers<[1], [0], [0], [1], [0, 0, 1, 1], [], []>} : vector<8x64xbf16>, vector<64x192xbf16>, vector<8x192xf32> -> vector<8x192xf32>
    %127 = vector.extract_strided_slice %124 {offsets = [0, 0], sizes = [8, 128], strides = [1, 1]} : vector<8x192xf32> to vector<8x128xf32>
    %128 = vector.extract_strided_slice %126 {offsets = [0, 0], sizes = [8, 128], strides = [1, 1]} : vector<8x192xf32> to vector<8x128xf32>
    %129 = arith.addf %127, %128 : vector<8x128xf32>
    %130 = arith.negf %129 : vector<8x128xf32>
    %131 = math.exp %130 : vector<8x128xf32>
    %cst_29 = arith.constant 1.000000e+00 : f32
    %132 = vector.broadcast %cst_29 : f32 to vector<8x128xf32>
    %133 = arith.addf %132, %131 : vector<8x128xf32>
    %134 = arith.divf %132, %133 : vector<8x128xf32>
    %135 = vector.extract_strided_slice %134 {offsets = [0, 0], sizes = [8, 64], strides = [1, 1]} : vector<8x128xf32> to vector<8x64xf32>
    %136 = vector.extract_strided_slice %134 {offsets = [0, 64], sizes = [8, 64], strides = [1, 1]} : vector<8x128xf32> to vector<8x64xf32>
    %137 = vector.extract_strided_slice %124 {offsets = [0, 128], sizes = [8, 64], strides = [1, 1]} : vector<8x192xf32> to vector<8x64xf32>
    %138 = vector.extract_strided_slice %126 {offsets = [0, 128], sizes = [8, 64], strides = [1, 1]} : vector<8x192xf32> to vector<8x64xf32>
    %139 = arith.addf %138, %18 : vector<8x64xf32>
    %140 = arith.mulf %135, %139 : vector<8x64xf32>
    %141 = arith.addf %137, %140 : vector<8x64xf32>
    %142 = math.tanh %141 : vector<8x64xf32>
    %cst_30 = arith.constant 1.000000e+00 : f32
    %143 = vector.broadcast %cst_30 : f32 to vector<8x64xf32>
    %144 = arith.subf %143, %136 : vector<8x64xf32>
    %145 = arith.mulf %144, %142 : vector<8x64xf32>
    %146 = arith.mulf %136, %121 : vector<8x64xf32>
    %147 = arith.addf %145, %146 : vector<8x64xf32>
    %c32_31 = arith.constant 32 : index
    %c0_32 = arith.constant 0 : index
    %148 = vector.load %arg5[%c32_31, %c0_32] : memref<64x128xf32, #tpu.memory_space<vmem>>, vector<8x64xf32>
    tpu.vector_store %arg5[%c32_31, %c0_32], %147 {strides = array<i32>} : memref<64x128xf32, #tpu.memory_space<vmem>>, vector<8x64xf32>,
    %c24_33 = arith.constant 24 : index
    %c64_34 = arith.constant 64 : index
    %149 = vector.load %arg5[%c24_33, %c64_34] : memref<64x128xf32, #tpu.memory_space<vmem>>, vector<8x64xf32>
    tpu.vector_store %arg5[%c24_33, %c64_34], %147 {strides = array<i32>} : memref<64x128xf32, #tpu.memory_space<vmem>>, vector<8x64xf32>,
    %150 = vector.extract_strided_slice %14 {offsets = [40, 0], sizes = [8, 192], strides = [1, 1]} : vector<64x192xf32> to vector<8x192xf32>
    %151 = arith.truncf %147 : vector<8x64xf32> to vector<8x64xbf16>
    %cst_35 = arith.constant dense<0.000000e+00> : vector<8x192xf32>
    %152 = tpu.matmul %151, %15, %cst_35 {dimension_numbers = #tpu.dot_dimension_numbers<[1], [0], [0], [1], [0, 0, 1, 1], [], []>} : vector<8x64xbf16>, vector<64x192xbf16>, vector<8x192xf32> -> vector<8x192xf32>
    %153 = vector.extract_strided_slice %150 {offsets = [0, 0], sizes = [8, 128], strides = [1, 1]} : vector<8x192xf32> to vector<8x128xf32>
    %154 = vector.extract_strided_slice %152 {offsets = [0, 0], sizes = [8, 128], strides = [1, 1]} : vector<8x192xf32> to vector<8x128xf32>
    %155 = arith.addf %153, %154 : vector<8x128xf32>
    %156 = arith.negf %155 : vector<8x128xf32>
    %157 = math.exp %156 : vector<8x128xf32>
    %cst_36 = arith.constant 1.000000e+00 : f32
    %158 = vector.broadcast %cst_36 : f32 to vector<8x128xf32>
    %159 = arith.addf %158, %157 : vector<8x128xf32>
    %160 = arith.divf %158, %159 : vector<8x128xf32>
    %161 = vector.extract_strided_slice %160 {offsets = [0, 0], sizes = [8, 64], strides = [1, 1]} : vector<8x128xf32> to vector<8x64xf32>
    %162 = vector.extract_strided_slice %160 {offsets = [0, 64], sizes = [8, 64], strides = [1, 1]} : vector<8x128xf32> to vector<8x64xf32>
    %163 = vector.extract_strided_slice %150 {offsets = [0, 128], sizes = [8, 64], strides = [1, 1]} : vector<8x192xf32> to vector<8x64xf32>
    %164 = vector.extract_strided_slice %152 {offsets = [0, 128], sizes = [8, 64], strides = [1, 1]} : vector<8x192xf32> to vector<8x64xf32>
    %165 = arith.addf %164, %18 : vector<8x64xf32>
    %166 = arith.mulf %161, %165 : vector<8x64xf32>
    %167 = arith.addf %163, %166 : vector<8x64xf32>
    %168 = math.tanh %167 : vector<8x64xf32>
    %cst_37 = arith.constant 1.000000e+00 : f32
    %169 = vector.broadcast %cst_37 : f32 to vector<8x64xf32>
    %170 = arith.subf %169, %162 : vector<8x64xf32>
    %171 = arith.mulf %170, %168 : vector<8x64xf32>
    %172 = arith.mulf %162, %147 : vector<8x64xf32>
    %173 = arith.addf %171, %172 : vector<8x64xf32>
    %c40_38 = arith.constant 40 : index
    %c0_39 = arith.constant 0 : index
    %174 = vector.load %arg5[%c40_38, %c0_39] : memref<64x128xf32, #tpu.memory_space<vmem>>, vector<8x64xf32>
    tpu.vector_store %arg5[%c40_38, %c0_39], %173 {strides = array<i32>} : memref<64x128xf32, #tpu.memory_space<vmem>>, vector<8x64xf32>,
    %c16_40 = arith.constant 16 : index
    %c64_41 = arith.constant 64 : index
    %175 = vector.load %arg5[%c16_40, %c64_41] : memref<64x128xf32, #tpu.memory_space<vmem>>, vector<8x64xf32>
    tpu.vector_store %arg5[%c16_40, %c64_41], %173 {strides = array<i32>} : memref<64x128xf32, #tpu.memory_space<vmem>>, vector<8x64xf32>,
    %176 = vector.extract_strided_slice %14 {offsets = [48, 0], sizes = [8, 192], strides = [1, 1]} : vector<64x192xf32> to vector<8x192xf32>
    %177 = arith.truncf %173 : vector<8x64xf32> to vector<8x64xbf16>
    %cst_42 = arith.constant dense<0.000000e+00> : vector<8x192xf32>
    %178 = tpu.matmul %177, %15, %cst_42 {dimension_numbers = #tpu.dot_dimension_numbers<[1], [0], [0], [1], [0, 0, 1, 1], [], []>} : vector<8x64xbf16>, vector<64x192xbf16>, vector<8x192xf32> -> vector<8x192xf32>
    %179 = vector.extract_strided_slice %176 {offsets = [0, 0], sizes = [8, 128], strides = [1, 1]} : vector<8x192xf32> to vector<8x128xf32>
    %180 = vector.extract_strided_slice %178 {offsets = [0, 0], sizes = [8, 128], strides = [1, 1]} : vector<8x192xf32> to vector<8x128xf32>
    %181 = arith.addf %179, %180 : vector<8x128xf32>
    %182 = arith.negf %181 : vector<8x128xf32>
    %183 = math.exp %182 : vector<8x128xf32>
    %cst_43 = arith.constant 1.000000e+00 : f32
    %184 = vector.broadcast %cst_43 : f32 to vector<8x128xf32>
    %185 = arith.addf %184, %183 : vector<8x128xf32>
    %186 = arith.divf %184, %185 : vector<8x128xf32>
    %187 = vector.extract_strided_slice %186 {offsets = [0, 0], sizes = [8, 64], strides = [1, 1]} : vector<8x128xf32> to vector<8x64xf32>
    %188 = vector.extract_strided_slice %186 {offsets = [0, 64], sizes = [8, 64], strides = [1, 1]} : vector<8x128xf32> to vector<8x64xf32>
    %189 = vector.extract_strided_slice %176 {offsets = [0, 128], sizes = [8, 64], strides = [1, 1]} : vector<8x192xf32> to vector<8x64xf32>
    %190 = vector.extract_strided_slice %178 {offsets = [0, 128], sizes = [8, 64], strides = [1, 1]} : vector<8x192xf32> to vector<8x64xf32>
    %191 = arith.addf %190, %18 : vector<8x64xf32>
    %192 = arith.mulf %187, %191 : vector<8x64xf32>
    %193 = arith.addf %189, %192 : vector<8x64xf32>
    %194 = math.tanh %193 : vector<8x64xf32>
    %cst_44 = arith.constant 1.000000e+00 : f32
    %195 = vector.broadcast %cst_44 : f32 to vector<8x64xf32>
    %196 = arith.subf %195, %188 : vector<8x64xf32>
    %197 = arith.mulf %196, %194 : vector<8x64xf32>
    %198 = arith.mulf %188, %173 : vector<8x64xf32>
    %199 = arith.addf %197, %198 : vector<8x64xf32>
    %c48_45 = arith.constant 48 : index
    %c0_46 = arith.constant 0 : index
    %200 = vector.load %arg5[%c48_45, %c0_46] : memref<64x128xf32, #tpu.memory_space<vmem>>, vector<8x64xf32>
    tpu.vector_store %arg5[%c48_45, %c0_46], %199 {strides = array<i32>} : memref<64x128xf32, #tpu.memory_space<vmem>>, vector<8x64xf32>,
    %c8_47 = arith.constant 8 : index
    %c64_48 = arith.constant 64 : index
    %201 = vector.load %arg5[%c8_47, %c64_48] : memref<64x128xf32, #tpu.memory_space<vmem>>, vector<8x64xf32>
    tpu.vector_store %arg5[%c8_47, %c64_48], %199 {strides = array<i32>} : memref<64x128xf32, #tpu.memory_space<vmem>>, vector<8x64xf32>,
    %202 = vector.extract_strided_slice %14 {offsets = [56, 0], sizes = [8, 192], strides = [1, 1]} : vector<64x192xf32> to vector<8x192xf32>
    %203 = arith.truncf %199 : vector<8x64xf32> to vector<8x64xbf16>
    %cst_49 = arith.constant dense<0.000000e+00> : vector<8x192xf32>
    %204 = tpu.matmul %203, %15, %cst_49 {dimension_numbers = #tpu.dot_dimension_numbers<[1], [0], [0], [1], [0, 0, 1, 1], [], []>} : vector<8x64xbf16>, vector<64x192xbf16>, vector<8x192xf32> -> vector<8x192xf32>
    %205 = vector.extract_strided_slice %202 {offsets = [0, 0], sizes = [8, 128], strides = [1, 1]} : vector<8x192xf32> to vector<8x128xf32>
    %206 = vector.extract_strided_slice %204 {offsets = [0, 0], sizes = [8, 128], strides = [1, 1]} : vector<8x192xf32> to vector<8x128xf32>
    %207 = arith.addf %205, %206 : vector<8x128xf32>
    %208 = arith.negf %207 : vector<8x128xf32>
    %209 = math.exp %208 : vector<8x128xf32>
    %cst_50 = arith.constant 1.000000e+00 : f32
    %210 = vector.broadcast %cst_50 : f32 to vector<8x128xf32>
    %211 = arith.addf %210, %209 : vector<8x128xf32>
    %212 = arith.divf %210, %211 : vector<8x128xf32>
    %213 = vector.extract_strided_slice %212 {offsets = [0, 0], sizes = [8, 64], strides = [1, 1]} : vector<8x128xf32> to vector<8x64xf32>
    %214 = vector.extract_strided_slice %212 {offsets = [0, 64], sizes = [8, 64], strides = [1, 1]} : vector<8x128xf32> to vector<8x64xf32>
    %215 = vector.extract_strided_slice %202 {offsets = [0, 128], sizes = [8, 64], strides = [1, 1]} : vector<8x192xf32> to vector<8x64xf32>
    %216 = vector.extract_strided_slice %204 {offsets = [0, 128], sizes = [8, 64], strides = [1, 1]} : vector<8x192xf32> to vector<8x64xf32>
    %217 = arith.addf %216, %18 : vector<8x64xf32>
    %218 = arith.mulf %213, %217 : vector<8x64xf32>
    %219 = arith.addf %215, %218 : vector<8x64xf32>
    %220 = math.tanh %219 : vector<8x64xf32>
    %cst_51 = arith.constant 1.000000e+00 : f32
    %221 = vector.broadcast %cst_51 : f32 to vector<8x64xf32>
    %222 = arith.subf %221, %214 : vector<8x64xf32>
    %223 = arith.mulf %222, %220 : vector<8x64xf32>
    %224 = arith.mulf %214, %199 : vector<8x64xf32>
    %225 = arith.addf %223, %224 : vector<8x64xf32>
    %c56_52 = arith.constant 56 : index
    %c0_53 = arith.constant 0 : index
    %226 = vector.load %arg5[%c56_52, %c0_53] : memref<64x128xf32, #tpu.memory_space<vmem>>, vector<8x64xf32>
    tpu.vector_store %arg5[%c56_52, %c0_53], %225 {strides = array<i32>} : memref<64x128xf32, #tpu.memory_space<vmem>>, vector<8x64xf32>,
    %c0_54 = arith.constant 0 : index
    %c64_55 = arith.constant 64 : index
    %227 = vector.load %arg5[%c0_54, %c64_55] : memref<64x128xf32, #tpu.memory_space<vmem>>, vector<8x64xf32>
    tpu.vector_store %arg5[%c0_54, %c64_55], %225 {strides = array<i32>} : memref<64x128xf32, #tpu.memory_space<vmem>>, vector<8x64xf32>,
    %c0_56 = arith.constant 0 : index
    %c0_57 = arith.constant 0 : index
    %228 = vector.load %arg5[%c0_56, %c0_57] : memref<64x128xf32, #tpu.memory_space<vmem>>, vector<64x128xf32>
    %229 = arith.truncf %228 : vector<64x128xf32> to vector<64x128xbf16>
    %c144 = arith.constant 144 : index
    %c0_58 = arith.constant 0 : index
    %230 = vector.load %arg2[%c144, %c0_58] : memref<528x192xbf16, #tpu.memory_space<vmem>>, vector<128x192xbf16>
    %cst_59 = arith.constant dense<0.000000e+00> : vector<64x192xf32>
    %231 = tpu.matmul %229, %230, %cst_59 {dimension_numbers = #tpu.dot_dimension_numbers<[1], [0], [0], [1], [0, 0, 1, 1], [], []>} : vector<64x128xbf16>, vector<128x192xbf16>, vector<64x192xf32> -> vector<64x192xf32>
    %c0_60 = arith.constant 0 : index
    %c0_61 = arith.constant 0 : index
    %232 = vector.load %arg3[%c0_60, %c0_61] : memref<8x192xf32, #tpu.memory_space<vmem>>, vector<1x192xf32>
    %233 = vector.broadcast %232 : vector<1x192xf32> to vector<64x192xf32>
    %234 = arith.addf %231, %233 : vector<64x192xf32>
    %c272 = arith.constant 272 : index
    %c0_62 = arith.constant 0 : index
    %235 = vector.load %arg2[%c272, %c0_62] : memref<528x192xbf16, #tpu.memory_space<vmem>>, vector<64x192xbf16>
    %c2 = arith.constant 2 : index
    %c0_63 = arith.constant 0 : index
    %236 = vector.load %arg3[%c2, %c0_63] : memref<8x192xf32, #tpu.memory_space<vmem>>, vector<1x64xf32>
    %237 = vector.shape_cast %236 : vector<1x64xf32> to vector<1x64xf32>
    %238 = vector.broadcast %237 : vector<1x64xf32> to vector<8x64xf32>
    %cst_64 = arith.constant 0.000000e+00 : f32
    %239 = vector.broadcast %cst_64 : f32 to vector<8x64xf32>
    %240 = vector.extract_strided_slice %234 {offsets = [0, 0], sizes = [8, 192], strides = [1, 1]} : vector<64x192xf32> to vector<8x192xf32>
    %241 = arith.truncf %239 : vector<8x64xf32> to vector<8x64xbf16>
    %cst_65 = arith.constant dense<0.000000e+00> : vector<8x192xf32>
    %242 = tpu.matmul %241, %235, %cst_65 {dimension_numbers = #tpu.dot_dimension_numbers<[1], [0], [0], [1], [0, 0, 1, 1], [], []>} : vector<8x64xbf16>, vector<64x192xbf16>, vector<8x192xf32> -> vector<8x192xf32>
    %243 = vector.extract_strided_slice %240 {offsets = [0, 0], sizes = [8, 128], strides = [1, 1]} : vector<8x192xf32> to vector<8x128xf32>
    %244 = vector.extract_strided_slice %242 {offsets = [0, 0], sizes = [8, 128], strides = [1, 1]} : vector<8x192xf32> to vector<8x128xf32>
    %245 = arith.addf %243, %244 : vector<8x128xf32>
    %246 = arith.negf %245 : vector<8x128xf32>
    %247 = math.exp %246 : vector<8x128xf32>
    %cst_66 = arith.constant 1.000000e+00 : f32
    %248 = vector.broadcast %cst_66 : f32 to vector<8x128xf32>
    %249 = arith.addf %248, %247 : vector<8x128xf32>
    %250 = arith.divf %248, %249 : vector<8x128xf32>
    %251 = vector.extract_strided_slice %250 {offsets = [0, 0], sizes = [8, 64], strides = [1, 1]} : vector<8x128xf32> to vector<8x64xf32>
    %252 = vector.extract_strided_slice %250 {offsets = [0, 64], sizes = [8, 64], strides = [1, 1]} : vector<8x128xf32> to vector<8x64xf32>
    %253 = vector.extract_strided_slice %240 {offsets = [0, 128], sizes = [8, 64], strides = [1, 1]} : vector<8x192xf32> to vector<8x64xf32>
    %254 = vector.extract_strided_slice %242 {offsets = [0, 128], sizes = [8, 64], strides = [1, 1]} : vector<8x192xf32> to vector<8x64xf32>
    %255 = arith.addf %254, %238 : vector<8x64xf32>
    %256 = arith.mulf %251, %255 : vector<8x64xf32>
    %257 = arith.addf %253, %256 : vector<8x64xf32>
    %258 = math.tanh %257 : vector<8x64xf32>
    %cst_67 = arith.constant 1.000000e+00 : f32
    %259 = vector.broadcast %cst_67 : f32 to vector<8x64xf32>
    %260 = arith.subf %259, %252 : vector<8x64xf32>
    %261 = arith.mulf %260, %258 : vector<8x64xf32>
    %262 = arith.mulf %252, %239 : vector<8x64xf32>
    %263 = arith.addf %261, %262 : vector<8x64xf32>
    %264 = vector.extract_strided_slice %234 {offsets = [8, 0], sizes = [8, 192], strides = [1, 1]} : vector<64x192xf32> to vector<8x192xf32>
    %265 = arith.truncf %263 : vector<8x64xf32> to vector<8x64xbf16>
    %cst_68 = arith.constant dense<0.000000e+00> : vector<8x192xf32>
    %266 = tpu.matmul %265, %235, %cst_68 {dimension_numbers = #tpu.dot_dimension_numbers<[1], [0], [0], [1], [0, 0, 1, 1], [], []>} : vector<8x64xbf16>, vector<64x192xbf16>, vector<8x192xf32> -> vector<8x192xf32>
    %267 = vector.extract_strided_slice %264 {offsets = [0, 0], sizes = [8, 128], strides = [1, 1]} : vector<8x192xf32> to vector<8x128xf32>
    %268 = vector.extract_strided_slice %266 {offsets = [0, 0], sizes = [8, 128], strides = [1, 1]} : vector<8x192xf32> to vector<8x128xf32>
    %269 = arith.addf %267, %268 : vector<8x128xf32>
    %270 = arith.negf %269 : vector<8x128xf32>
    %271 = math.exp %270 : vector<8x128xf32>
    %cst_69 = arith.constant 1.000000e+00 : f32
    %272 = vector.broadcast %cst_69 : f32 to vector<8x128xf32>
    %273 = arith.addf %272, %271 : vector<8x128xf32>
    %274 = arith.divf %272, %273 : vector<8x128xf32>
    %275 = vector.extract_strided_slice %274 {offsets = [0, 0], sizes = [8, 64], strides = [1, 1]} : vector<8x128xf32> to vector<8x64xf32>
    %276 = vector.extract_strided_slice %274 {offsets = [0, 64], sizes = [8, 64], strides = [1, 1]} : vector<8x128xf32> to vector<8x64xf32>
    %277 = vector.extract_strided_slice %264 {offsets = [0, 128], sizes = [8, 64], strides = [1, 1]} : vector<8x192xf32> to vector<8x64xf32>
    %278 = vector.extract_strided_slice %266 {offsets = [0, 128], sizes = [8, 64], strides = [1, 1]} : vector<8x192xf32> to vector<8x64xf32>
    %279 = arith.addf %278, %238 : vector<8x64xf32>
    %280 = arith.mulf %275, %279 : vector<8x64xf32>
    %281 = arith.addf %277, %280 : vector<8x64xf32>
    %282 = math.tanh %281 : vector<8x64xf32>
    %cst_70 = arith.constant 1.000000e+00 : f32
    %283 = vector.broadcast %cst_70 : f32 to vector<8x64xf32>
    %284 = arith.subf %283, %276 : vector<8x64xf32>
    %285 = arith.mulf %284, %282 : vector<8x64xf32>
    %286 = arith.mulf %276, %263 : vector<8x64xf32>
    %287 = arith.addf %285, %286 : vector<8x64xf32>
    %288 = vector.extract_strided_slice %234 {offsets = [16, 0], sizes = [8, 192], strides = [1, 1]} : vector<64x192xf32> to vector<8x192xf32>
    %289 = arith.truncf %287 : vector<8x64xf32> to vector<8x64xbf16>
    %cst_71 = arith.constant dense<0.000000e+00> : vector<8x192xf32>
    %290 = tpu.matmul %289, %235, %cst_71 {dimension_numbers = #tpu.dot_dimension_numbers<[1], [0], [0], [1], [0, 0, 1, 1], [], []>} : vector<8x64xbf16>, vector<64x192xbf16>, vector<8x192xf32> -> vector<8x192xf32>
    %291 = vector.extract_strided_slice %288 {offsets = [0, 0], sizes = [8, 128], strides = [1, 1]} : vector<8x192xf32> to vector<8x128xf32>
    %292 = vector.extract_strided_slice %290 {offsets = [0, 0], sizes = [8, 128], strides = [1, 1]} : vector<8x192xf32> to vector<8x128xf32>
    %293 = arith.addf %291, %292 : vector<8x128xf32>
    %294 = arith.negf %293 : vector<8x128xf32>
    %295 = math.exp %294 : vector<8x128xf32>
    %cst_72 = arith.constant 1.000000e+00 : f32
    %296 = vector.broadcast %cst_72 : f32 to vector<8x128xf32>
    %297 = arith.addf %296, %295 : vector<8x128xf32>
    %298 = arith.divf %296, %297 : vector<8x128xf32>
    %299 = vector.extract_strided_slice %298 {offsets = [0, 0], sizes = [8, 64], strides = [1, 1]} : vector<8x128xf32> to vector<8x64xf32>
    %300 = vector.extract_strided_slice %298 {offsets = [0, 64], sizes = [8, 64], strides = [1, 1]} : vector<8x128xf32> to vector<8x64xf32>
    %301 = vector.extract_strided_slice %288 {offsets = [0, 128], sizes = [8, 64], strides = [1, 1]} : vector<8x192xf32> to vector<8x64xf32>
    %302 = vector.extract_strided_slice %290 {offsets = [0, 128], sizes = [8, 64], strides = [1, 1]} : vector<8x192xf32> to vector<8x64xf32>
    %303 = arith.addf %302, %238 : vector<8x64xf32>
    %304 = arith.mulf %299, %303 : vector<8x64xf32>
    %305 = arith.addf %301, %304 : vector<8x64xf32>
    %306 = math.tanh %305 : vector<8x64xf32>
    %cst_73 = arith.constant 1.000000e+00 : f32
    %307 = vector.broadcast %cst_73 : f32 to vector<8x64xf32>
    %308 = arith.subf %307, %300 : vector<8x64xf32>
    %309 = arith.mulf %308, %306 : vector<8x64xf32>
    %310 = arith.mulf %300, %287 : vector<8x64xf32>
    %311 = arith.addf %309, %310 : vector<8x64xf32>
    %312 = vector.extract_strided_slice %234 {offsets = [24, 0], sizes = [8, 192], strides = [1, 1]} : vector<64x192xf32> to vector<8x192xf32>
    %313 = arith.truncf %311 : vector<8x64xf32> to vector<8x64xbf16>
    %cst_74 = arith.constant dense<0.000000e+00> : vector<8x192xf32>
    %314 = tpu.matmul %313, %235, %cst_74 {dimension_numbers = #tpu.dot_dimension_numbers<[1], [0], [0], [1], [0, 0, 1, 1], [], []>} : vector<8x64xbf16>, vector<64x192xbf16>, vector<8x192xf32> -> vector<8x192xf32>
    %315 = vector.extract_strided_slice %312 {offsets = [0, 0], sizes = [8, 128], strides = [1, 1]} : vector<8x192xf32> to vector<8x128xf32>
    %316 = vector.extract_strided_slice %314 {offsets = [0, 0], sizes = [8, 128], strides = [1, 1]} : vector<8x192xf32> to vector<8x128xf32>
    %317 = arith.addf %315, %316 : vector<8x128xf32>
    %318 = arith.negf %317 : vector<8x128xf32>
    %319 = math.exp %318 : vector<8x128xf32>
    %cst_75 = arith.constant 1.000000e+00 : f32
    %320 = vector.broadcast %cst_75 : f32 to vector<8x128xf32>
    %321 = arith.addf %320, %319 : vector<8x128xf32>
    %322 = arith.divf %320, %321 : vector<8x128xf32>
    %323 = vector.extract_strided_slice %322 {offsets = [0, 0], sizes = [8, 64], strides = [1, 1]} : vector<8x128xf32> to vector<8x64xf32>
    %324 = vector.extract_strided_slice %322 {offsets = [0, 64], sizes = [8, 64], strides = [1, 1]} : vector<8x128xf32> to vector<8x64xf32>
    %325 = vector.extract_strided_slice %312 {offsets = [0, 128], sizes = [8, 64], strides = [1, 1]} : vector<8x192xf32> to vector<8x64xf32>
    %326 = vector.extract_strided_slice %314 {offsets = [0, 128], sizes = [8, 64], strides = [1, 1]} : vector<8x192xf32> to vector<8x64xf32>
    %327 = arith.addf %326, %238 : vector<8x64xf32>
    %328 = arith.mulf %323, %327 : vector<8x64xf32>
    %329 = arith.addf %325, %328 : vector<8x64xf32>
    %330 = math.tanh %329 : vector<8x64xf32>
    %cst_76 = arith.constant 1.000000e+00 : f32
    %331 = vector.broadcast %cst_76 : f32 to vector<8x64xf32>
    %332 = arith.subf %331, %324 : vector<8x64xf32>
    %333 = arith.mulf %332, %330 : vector<8x64xf32>
    %334 = arith.mulf %324, %311 : vector<8x64xf32>
    %335 = arith.addf %333, %334 : vector<8x64xf32>
    %336 = vector.extract_strided_slice %234 {offsets = [32, 0], sizes = [8, 192], strides = [1, 1]} : vector<64x192xf32> to vector<8x192xf32>
    %337 = arith.truncf %335 : vector<8x64xf32> to vector<8x64xbf16>
    %cst_77 = arith.constant dense<0.000000e+00> : vector<8x192xf32>
    %338 = tpu.matmul %337, %235, %cst_77 {dimension_numbers = #tpu.dot_dimension_numbers<[1], [0], [0], [1], [0, 0, 1, 1], [], []>} : vector<8x64xbf16>, vector<64x192xbf16>, vector<8x192xf32> -> vector<8x192xf32>
    %339 = vector.extract_strided_slice %336 {offsets = [0, 0], sizes = [8, 128], strides = [1, 1]} : vector<8x192xf32> to vector<8x128xf32>
    %340 = vector.extract_strided_slice %338 {offsets = [0, 0], sizes = [8, 128], strides = [1, 1]} : vector<8x192xf32> to vector<8x128xf32>
    %341 = arith.addf %339, %340 : vector<8x128xf32>
    %342 = arith.negf %341 : vector<8x128xf32>
    %343 = math.exp %342 : vector<8x128xf32>
    %cst_78 = arith.constant 1.000000e+00 : f32
    %344 = vector.broadcast %cst_78 : f32 to vector<8x128xf32>
    %345 = arith.addf %344, %343 : vector<8x128xf32>
    %346 = arith.divf %344, %345 : vector<8x128xf32>
    %347 = vector.extract_strided_slice %346 {offsets = [0, 0], sizes = [8, 64], strides = [1, 1]} : vector<8x128xf32> to vector<8x64xf32>
    %348 = vector.extract_strided_slice %346 {offsets = [0, 64], sizes = [8, 64], strides = [1, 1]} : vector<8x128xf32> to vector<8x64xf32>
    %349 = vector.extract_strided_slice %336 {offsets = [0, 128], sizes = [8, 64], strides = [1, 1]} : vector<8x192xf32> to vector<8x64xf32>
    %350 = vector.extract_strided_slice %338 {offsets = [0, 128], sizes = [8, 64], strides = [1, 1]} : vector<8x192xf32> to vector<8x64xf32>
    %351 = arith.addf %350, %238 : vector<8x64xf32>
    %352 = arith.mulf %347, %351 : vector<8x64xf32>
    %353 = arith.addf %349, %352 : vector<8x64xf32>
    %354 = math.tanh %353 : vector<8x64xf32>
    %cst_79 = arith.constant 1.000000e+00 : f32
    %355 = vector.broadcast %cst_79 : f32 to vector<8x64xf32>
    %356 = arith.subf %355, %348 : vector<8x64xf32>
    %357 = arith.mulf %356, %354 : vector<8x64xf32>
    %358 = arith.mulf %348, %335 : vector<8x64xf32>
    %359 = arith.addf %357, %358 : vector<8x64xf32>
    %360 = vector.extract_strided_slice %234 {offsets = [40, 0], sizes = [8, 192], strides = [1, 1]} : vector<64x192xf32> to vector<8x192xf32>
    %361 = arith.truncf %359 : vector<8x64xf32> to vector<8x64xbf16>
    %cst_80 = arith.constant dense<0.000000e+00> : vector<8x192xf32>
    %362 = tpu.matmul %361, %235, %cst_80 {dimension_numbers = #tpu.dot_dimension_numbers<[1], [0], [0], [1], [0, 0, 1, 1], [], []>} : vector<8x64xbf16>, vector<64x192xbf16>, vector<8x192xf32> -> vector<8x192xf32>
    %363 = vector.extract_strided_slice %360 {offsets = [0, 0], sizes = [8, 128], strides = [1, 1]} : vector<8x192xf32> to vector<8x128xf32>
    %364 = vector.extract_strided_slice %362 {offsets = [0, 0], sizes = [8, 128], strides = [1, 1]} : vector<8x192xf32> to vector<8x128xf32>
    %365 = arith.addf %363, %364 : vector<8x128xf32>
    %366 = arith.negf %365 : vector<8x128xf32>
    %367 = math.exp %366 : vector<8x128xf32>
    %cst_81 = arith.constant 1.000000e+00 : f32
    %368 = vector.broadcast %cst_81 : f32 to vector<8x128xf32>
    %369 = arith.addf %368, %367 : vector<8x128xf32>
    %370 = arith.divf %368, %369 : vector<8x128xf32>
    %371 = vector.extract_strided_slice %370 {offsets = [0, 0], sizes = [8, 64], strides = [1, 1]} : vector<8x128xf32> to vector<8x64xf32>
    %372 = vector.extract_strided_slice %370 {offsets = [0, 64], sizes = [8, 64], strides = [1, 1]} : vector<8x128xf32> to vector<8x64xf32>
    %373 = vector.extract_strided_slice %360 {offsets = [0, 128], sizes = [8, 64], strides = [1, 1]} : vector<8x192xf32> to vector<8x64xf32>
    %374 = vector.extract_strided_slice %362 {offsets = [0, 128], sizes = [8, 64], strides = [1, 1]} : vector<8x192xf32> to vector<8x64xf32>
    %375 = arith.addf %374, %238 : vector<8x64xf32>
    %376 = arith.mulf %371, %375 : vector<8x64xf32>
    %377 = arith.addf %373, %376 : vector<8x64xf32>
    %378 = math.tanh %377 : vector<8x64xf32>
    %cst_82 = arith.constant 1.000000e+00 : f32
    %379 = vector.broadcast %cst_82 : f32 to vector<8x64xf32>
    %380 = arith.subf %379, %372 : vector<8x64xf32>
    %381 = arith.mulf %380, %378 : vector<8x64xf32>
    %382 = arith.mulf %372, %359 : vector<8x64xf32>
    %383 = arith.addf %381, %382 : vector<8x64xf32>
    %384 = vector.extract_strided_slice %234 {offsets = [48, 0], sizes = [8, 192], strides = [1, 1]} : vector<64x192xf32> to vector<8x192xf32>
    %385 = arith.truncf %383 : vector<8x64xf32> to vector<8x64xbf16>
    %cst_83 = arith.constant dense<0.000000e+00> : vector<8x192xf32>
    %386 = tpu.matmul %385, %235, %cst_83 {dimension_numbers = #tpu.dot_dimension_numbers<[1], [0], [0], [1], [0, 0, 1, 1], [], []>} : vector<8x64xbf16>, vector<64x192xbf16>, vector<8x192xf32> -> vector<8x192xf32>
    %387 = vector.extract_strided_slice %384 {offsets = [0, 0], sizes = [8, 128], strides = [1, 1]} : vector<8x192xf32> to vector<8x128xf32>
    %388 = vector.extract_strided_slice %386 {offsets = [0, 0], sizes = [8, 128], strides = [1, 1]} : vector<8x192xf32> to vector<8x128xf32>
    %389 = arith.addf %387, %388 : vector<8x128xf32>
    %390 = arith.negf %389 : vector<8x128xf32>
    %391 = math.exp %390 : vector<8x128xf32>
    %cst_84 = arith.constant 1.000000e+00 : f32
    %392 = vector.broadcast %cst_84 : f32 to vector<8x128xf32>
    %393 = arith.addf %392, %391 : vector<8x128xf32>
    %394 = arith.divf %392, %393 : vector<8x128xf32>
    %395 = vector.extract_strided_slice %394 {offsets = [0, 0], sizes = [8, 64], strides = [1, 1]} : vector<8x128xf32> to vector<8x64xf32>
    %396 = vector.extract_strided_slice %394 {offsets = [0, 64], sizes = [8, 64], strides = [1, 1]} : vector<8x128xf32> to vector<8x64xf32>
    %397 = vector.extract_strided_slice %384 {offsets = [0, 128], sizes = [8, 64], strides = [1, 1]} : vector<8x192xf32> to vector<8x64xf32>
    %398 = vector.extract_strided_slice %386 {offsets = [0, 128], sizes = [8, 64], strides = [1, 1]} : vector<8x192xf32> to vector<8x64xf32>
    %399 = arith.addf %398, %238 : vector<8x64xf32>
    %400 = arith.mulf %395, %399 : vector<8x64xf32>
    %401 = arith.addf %397, %400 : vector<8x64xf32>
    %402 = math.tanh %401 : vector<8x64xf32>
    %cst_85 = arith.constant 1.000000e+00 : f32
    %403 = vector.broadcast %cst_85 : f32 to vector<8x64xf32>
    %404 = arith.subf %403, %396 : vector<8x64xf32>
    %405 = arith.mulf %404, %402 : vector<8x64xf32>
    %406 = arith.mulf %396, %383 : vector<8x64xf32>
    %407 = arith.addf %405, %406 : vector<8x64xf32>
    %408 = vector.extract_strided_slice %234 {offsets = [56, 0], sizes = [8, 192], strides = [1, 1]} : vector<64x192xf32> to vector<8x192xf32>
    %409 = arith.truncf %407 : vector<8x64xf32> to vector<8x64xbf16>
    %cst_86 = arith.constant dense<0.000000e+00> : vector<8x192xf32>
    %410 = tpu.matmul %409, %235, %cst_86 {dimension_numbers = #tpu.dot_dimension_numbers<[1], [0], [0], [1], [0, 0, 1, 1], [], []>} : vector<8x64xbf16>, vector<64x192xbf16>, vector<8x192xf32> -> vector<8x192xf32>
    %411 = vector.extract_strided_slice %408 {offsets = [0, 0], sizes = [8, 128], strides = [1, 1]} : vector<8x192xf32> to vector<8x128xf32>
    %412 = vector.extract_strided_slice %410 {offsets = [0, 0], sizes = [8, 128], strides = [1, 1]} : vector<8x192xf32> to vector<8x128xf32>
    %413 = arith.addf %411, %412 : vector<8x128xf32>
    %414 = arith.negf %413 : vector<8x128xf32>
    %415 = math.exp %414 : vector<8x128xf32>
    %cst_87 = arith.constant 1.000000e+00 : f32
    %416 = vector.broadcast %cst_87 : f32 to vector<8x128xf32>
    %417 = arith.addf %416, %415 : vector<8x128xf32>
    %418 = arith.divf %416, %417 : vector<8x128xf32>
    %419 = vector.extract_strided_slice %418 {offsets = [0, 0], sizes = [8, 64], strides = [1, 1]} : vector<8x128xf32> to vector<8x64xf32>
    %420 = vector.extract_strided_slice %418 {offsets = [0, 64], sizes = [8, 64], strides = [1, 1]} : vector<8x128xf32> to vector<8x64xf32>
    %421 = vector.extract_strided_slice %408 {offsets = [0, 128], sizes = [8, 64], strides = [1, 1]} : vector<8x192xf32> to vector<8x64xf32>
    %422 = vector.extract_strided_slice %410 {offsets = [0, 128], sizes = [8, 64], strides = [1, 1]} : vector<8x192xf32> to vector<8x64xf32>
    %423 = arith.addf %422, %238 : vector<8x64xf32>
    %424 = arith.mulf %419, %423 : vector<8x64xf32>
    %425 = arith.addf %421, %424 : vector<8x64xf32>
    %426 = math.tanh %425 : vector<8x64xf32>
    %cst_88 = arith.constant 1.000000e+00 : f32
    %427 = vector.broadcast %cst_88 : f32 to vector<8x64xf32>
    %428 = arith.subf %427, %420 : vector<8x64xf32>
    %429 = arith.mulf %428, %426 : vector<8x64xf32>
    %430 = arith.mulf %420, %407 : vector<8x64xf32>
    %431 = arith.addf %429, %430 : vector<8x64xf32>
    %432 = arith.addf %225, %431 : vector<8x64xf32>
    %433 = vector.extract_strided_slice %432 {offsets = [0, 0], sizes = [8, 32], strides = [1, 1]} : vector<8x64xf32> to vector<8x32xf32>
    %434 = vector.extract_strided_slice %432 {offsets = [0, 32], sizes = [8, 32], strides = [1, 1]} : vector<8x64xf32> to vector<8x32xf32>
    %435 = arith.addf %433, %434 : vector<8x32xf32>
    %c6_i32 = arith.constant 6 : i32
    %436 = tpu.dynamic_rotate %435 by %c6_i32 dim 0 : vector<8x32xf32>, i32 -> vector<8x32xf32>
    %437 = tpu.concatenate %435, %436 in 1 : vector<8x32xf32>, vector<8x32xf32> -> vector<8x64xf32>
    %438 = arith.truncf %437 : vector<8x64xf32> to vector<8x64xbf16>
    %c336 = arith.constant 336 : index
    %c0_89 = arith.constant 0 : index
    %439 = vector.load %arg2[%c336, %c0_89] : memref<528x192xbf16, #tpu.memory_space<vmem>>, vector<64x64xbf16>
    %c400 = arith.constant 400 : index
    %c0_90 = arith.constant 0 : index
    %440 = vector.load %arg2[%c400, %c0_90] : memref<528x192xbf16, #tpu.memory_space<vmem>>, vector<64x64xbf16>
    %c464 = arith.constant 464 : index
    %c0_91 = arith.constant 0 : index
    %441 = vector.load %arg2[%c464, %c0_91] : memref<528x192xbf16, #tpu.memory_space<vmem>>, vector<64x64xbf16>
    %cst_92 = arith.constant dense<0.000000e+00> : vector<8x64xf32>
    %442 = tpu.matmul %438, %439, %cst_92 {dimension_numbers = #tpu.dot_dimension_numbers<[1], [0], [0], [1], [0, 0, 1, 1], [], []>} : vector<8x64xbf16>, vector<64x64xbf16>, vector<8x64xf32> -> vector<8x64xf32>
    %c3 = arith.constant 3 : index
    %c0_93 = arith.constant 0 : index
    %443 = vector.load %arg3[%c3, %c0_93] : memref<8x192xf32, #tpu.memory_space<vmem>>, vector<1x64xf32>
    %444 = vector.broadcast %443 : vector<1x64xf32> to vector<8x64xf32>
    %445 = arith.addf %442, %444 : vector<8x64xf32>
    %cst_94 = arith.constant 0.000000e+00 : f32
    %446 = vector.broadcast %cst_94 : f32 to vector<8x64xf32>
    %447 = arith.maximumf %445, %446 : vector<8x64xf32>
    %448 = arith.truncf %447 : vector<8x64xf32> to vector<8x64xbf16>
    %cst_95 = arith.constant dense<0.000000e+00> : vector<8x64xf32>
    %449 = tpu.matmul %448, %440, %cst_95 {dimension_numbers = #tpu.dot_dimension_numbers<[1], [0], [0], [1], [0, 0, 1, 1], [], []>} : vector<8x64xbf16>, vector<64x64xbf16>, vector<8x64xf32> -> vector<8x64xf32>
    %c4 = arith.constant 4 : index
    %c0_96 = arith.constant 0 : index
    %450 = vector.load %arg3[%c4, %c0_96] : memref<8x192xf32, #tpu.memory_space<vmem>>, vector<1x64xf32>
    %451 = vector.broadcast %450 : vector<1x64xf32> to vector<8x64xf32>
    %452 = arith.addf %449, %451 : vector<8x64xf32>
    %cst_97 = arith.constant 0.000000e+00 : f32
    %453 = vector.broadcast %cst_97 : f32 to vector<8x64xf32>
    %454 = arith.maximumf %452, %453 : vector<8x64xf32>
    %455 = arith.truncf %454 : vector<8x64xf32> to vector<8x64xbf16>
    %cst_98 = arith.constant dense<0.000000e+00> : vector<8x64xf32>
    %456 = tpu.matmul %455, %441, %cst_98 {dimension_numbers = #tpu.dot_dimension_numbers<[1], [0], [0], [1], [0, 0, 1, 1], [], []>} : vector<8x64xbf16>, vector<64x64xbf16>, vector<8x64xf32> -> vector<8x64xf32>
    %c5 = arith.constant 5 : index
    %c0_99 = arith.constant 0 : index
    %457 = vector.load %arg3[%c5, %c0_99] : memref<8x192xf32, #tpu.memory_space<vmem>>, vector<1x64xf32>
    %458 = vector.broadcast %457 : vector<1x64xf32> to vector<8x64xf32>
    %459 = arith.addf %456, %458 : vector<8x64xf32>
    %c0_100 = arith.constant 0 : index
    %c0_101 = arith.constant 0 : index
    %460 = vector.load %arg4[%c0_100, %c0_101] : memref<8x64xf32, #tpu.memory_space<vmem>>, vector<8x64xf32>
    tpu.vector_store %arg4[%c0_100, %c0_101], %459 {strides = array<i32>} : memref<8x64xf32, #tpu.memory_space<vmem>>, vector<8x64xf32>,
    return
  }
  func.func @transform_0(%arg0: i32) -> (i32, i32) {
    %c0_i32 = arith.constant 0 : i32
    %c0_i32_0 = arith.constant 0 : i32
    %c0_i32_1 = arith.constant 0 : i32
    return %c0_i32, %c0_i32_0 : i32, i32
  }
  func.func @transform_1(%arg0: i32) -> (i32, i32) {
    %c0_i32 = arith.constant 0 : i32
    %c0_i32_0 = arith.constant 0 : i32
    %c0_i32_1 = arith.constant 0 : i32
    return %c0_i32, %c0_i32_0 : i32, i32
  }
  func.func @transform_2(%arg0: i32) -> (i32, i32) {
    %c0_i32 = arith.constant 0 : i32
    %c0_i32_0 = arith.constant 0 : i32
    %c0_i32_1 = arith.constant 0 : i32
    return %c0_i32, %c0_i32_0 : i32, i32
  }
  func.func @transform_3(%arg0: i32) -> (i32, i32) {
    %c0_i32 = arith.constant 0 : i32
    %c0_i32_0 = arith.constant 0 : i32
    %c0_i32_1 = arith.constant 0 : i32
    return %c0_i32, %c0_i32_0 : i32, i32
  }
}

</mosaic_0001>

<bundles_post_ra>
// kernel: ac_pred_gru_forward.1
= control target key start
LH: loop header
LB: loop body
LE: loop exit
PB: predicated region body
PF: predicated region fallthrough
CT: control target
= control target key end

     0   :  { %v2243_v0 = vmov 1   ;;  %v2244_v1 = vmov 0   ;;  %v23_v22 = vlaneseq  ;;  %v2245_v28 = vmov 0.0   ;;  %s2246_s27 = smov 64   ;;  %s2247_s11 = smov 96   ;;  %s2939_s0 = inlined_call_operand.vmem [shape: s32[64,2], index: 0, kind: input, shape index: {}]   ;;  %s2940_s1 = inlined_call_operand.vmem [shape: bf16[528,192], index: 1, kind: input, shape index: {}]   ;;  %s2941_s2 = inlined_call_operand.vmem [shape: f32[8,192], index: 2, kind: input, shape index: {}]   ;;  %s2942_s3 = inlined_call_operand.vmem [shape: f32[8,64], index: 3, kind: output, shape index: {}]  }
   0x1   :  { %2062 = vset.pattern.permute.xlu1 %v2243_v0  ;;  %2061 = vset.pattern.permute.xlu0 %v2244_v1  ;;  %v15_v2 = vld [vmem:[%s2939_s0] sm:$0xff]  ;;  %v16_v3 = vld [vmem:[%s2939_s0 + $0x8] sm:$0xff]  ;;  %v2287_v6 = vld [vmem:[%s2940_s1 + $0x54] ss:$8 sps:$4 sm:$0xff]   ;;  %vm169_vm6 = vcmask 654336   ;;  %vm373_vm7 = vcmask 1048064  }
   0x2   :  { %58 = vperm.xlu1 %2062, %v15_v2   ;;  %26 = vperm.xlu0 %2061, %v15_v2   ;;  %v2072_v4 = vld [vmem:[%s2940_s1 + $0x4] ss:$8 sps:$4 sm:$0xff]   ;;  %v2074_v5 = vld [vmem:[%s2940_s1] ss:$8 sps:$4 sm:$0xff]   ;;  %v2294_v7 = vld [vmem:[%s2940_s1 + $0x50] ss:$8 sps:$4 sm:$0xff]  }
   0x3   :  { %340 = vmatprep.mubr.bf16.mxu1 %v2244_v1  ;;  %214 = vmatprep.mubr.bf16.mxu0 %v2244_v1  ;;  %v2078_v8 = vld [vmem:[%s2940_s1 + $0x14] ss:$8 sps:$4 sm:$0xff]   ;;  %v2080_v9 = vld [vmem:[%s2940_s1 + $0x10] ss:$8 sps:$4 sm:$0xff]   ;;  %v2306_v10 = vld [vmem:[%s2940_s1 + $0x64] ss:$8 sps:$4 sm:$0xff]  }
   0x4   :  { %182 = vmatprep.subr.bf16.mxu0 %v2072_v4  ;;  %308 = vmatprep.subr.bf16.mxu1 %v2287_v6  ;;  %v2311_v11 = vld [vmem:[%s2940_s1 + $0x60] ss:$8 sps:$4 sm:$0xff]   ;;  %v2084_v12 = vld [vmem:[%s2940_s1 + $0x24] ss:$8 sps:$4 sm:$0xff]   ;;  %v2324_v14 = vld [vmem:[%s2940_s1 + $0x74] ss:$8 sps:$4 sm:$0xff]  }
   0x5   :  { %183 = vmatpush1.bf16.msra.mxu0 %v2074_v5  ;;  %309 = vmatpush1.bf16.msra.mxu1 %v2294_v7  ;;  %v2086_v13 = vld [vmem:[%s2940_s1 + $0x20] ss:$8 sps:$4 sm:$0xff]   ;;  %v2329_v15 = vld [vmem:[%s2940_s1 + $0x70] ss:$8 sps:$4 sm:$0xff]   ;;  %v2090_v16 = vld [vmem:[%s2940_s1 + $0x34] ss:$8 sps:$4 sm:$0xff]  }
   0x6   :  { %61 = vperm.xlu1 %2062, %v16_v3   ;;  %29 = vperm.xlu0 %2061, %v16_v3   ;;  %v2092_v17 = vld [vmem:[%s2940_s1 + $0x30] ss:$8 sps:$4 sm:$0xff]   ;;  %v2343_v18 = vld [vmem:[%s2940_s1 + $0x84] ss:$8 sps:$4 sm:$0xff]   ;;  %v2348_v19 = vld [vmem:[%s2940_s1 + $0x80] ss:$8 sps:$4 sm:$0xff]  }
   0x7   :  { %184 = vmatprep.subr.bf16.mxu0 %v2078_v8  ;;  %310 = vmatprep.subr.bf16.mxu1 %v2306_v10  ;;  %v2096_v20 = vld [vmem:[%s2940_s1 + $0x44] ss:$8 sps:$4 sm:$0xff]   ;;  %v2098_v21 = vld [vmem:[%s2940_s1 + $0x40] ss:$8 sps:$4 sm:$0xff]   ;;  %v2372_v23 = vand.u32 127, %v23_v22  ;;  %vm304_vm8 = vcmask 523264  }
   0x8   :  { %v2393_v44 = vld [vmem:[%s2941_s2 + $0x1] ss:$0 sm:$0xff]  ;;  %v17_v57 = vld [vmem:[%s2939_s0 + $0x10] sm:$0xff]  ;;  %s2249_s22 = smov 32  }
   0x9   :  { %185 = vmatpush1.bf16.msra.mxu0 %v2080_v9  ;;  %311 = vmatpush1.bf16.msra.mxu1 %v2311_v11 }
   0xa   :  { %186 = vmatprep.subr.bf16.mxu0 %v2084_v12  ;;  %2063 = vset.pattern.permute.xlu1 %v2244_v1 }
   0xb   :  { %312 = vmatprep.subr.bf16.mxu1 %v2324_v14 }
   0xd   :  { %187 = vmatpush1.bf16.msra.mxu0 %v2086_v13  ;;  %313 = vmatpush1.bf16.msra.mxu1 %v2329_v15  ;;  %v18_v13 = vld [vmem:[%s2939_s0 + $0x18] sm:$0xff] }
   0xe   :  { %188 = vmatprep.subr.bf16.mxu0 %v2090_v16  ;;  %314 = vmatprep.subr.bf16.mxu1 %v2343_v18 }
  0x11   :  { %189 = vmatpush1.bf16.msra.mxu0 %v2092_v17  ;;  %315 = vmatpush1.bf16.msra.mxu1 %v2348_v19 }
  0x12   :  { %190 = vmatprep.subr.bf16.mxu0 %v2096_v20  ;;  %382 = vmatprep.subr.bf16.mxu1 %v2287_v6 }
  0x14   :  { %341 = vmatmul.mubr.bf16.vlgmr.msra.gmra.mrb[0].mxu1 %v2244_v1 }
  0x15   :  { %191 = vmatpush1.bf16.msra.mxu0 %v2098_v21  ;;  %383 = vmatpush1.bf16.msra.mxu1 %v2294_v7 }
  0x16   :  { %528 = vmatprep.subr.bf16.mxu0 %v2287_v6  ;;  %414 = vmatprep.mubr.bf16.mxu1 %v2244_v1 }
  0x17   :  { %384 = vmatprep.subr.bf16.mxu1 %v2306_v10 }
  0x19   :  { %385 = vmatpush1.bf16.msra.mxu1 %v2311_v11 }
  0x1a   :  { %386 = vmatprep.subr.bf16.mxu1 %v2324_v14 }
  0x1d   :  { %387 = vmatpush1.bf16.msra.mxu1 %v2329_v15 }
  0x1e   :  { %388 = vmatprep.subr.bf16.mxu1 %v2343_v18 }
  0x21   :  { %389 = vmatpush1.bf16.msra.mxu1 %v2348_v19 }
  0x22   :  { %455 = vmatprep.subr.bf16.mxu1 %v2287_v6 }
  0x81   :  { %v59_v24 = vpop.permute.xlu1 %58  ;;  %v27_v25 = vpop.permute.xlu0 %26 }
  0x82   :  { %vm81_vm0 = vcmp.eq.s32.totalorder %v2372_v23, %v59_v24  ;;  %vm49_vm1 = vcmp.eq.s32.totalorder %v2372_v23, %v27_v25 }
  0x83   :  { %vm89_vm2 = vmor %vm49_vm1, %vm81_vm0 }
  0x84   :  { %v97_v29 = vsel %vm89_vm2, 1.0, %v2245_v28 }
  0x85   :  { %v62_v26 = vpop.permute.xlu1 %61  ;;  %v30_v27 = vpop.permute.xlu0 %29 }
  0x86   :  { %vm82_vm3 = vcmp.eq.s32.totalorder %v2372_v23, %v62_v26  ;;  %vm50_vm4 = vcmp.eq.s32.totalorder %v2372_v23, %v30_v27 }
  0x87   :  { %vm90_vm5 = vmor %vm50_vm4, %vm82_vm3 }
  0x88   :  { %v98_v30 = vsel %vm90_vm5, 1.0, %v2245_v28 }
  0x89   :  { %v105_v31 = vpack.c.bf16 %v98_v30, %v97_v29 }
  0x8b   :  { %1922 = vmatmul.mubr.msk.bf16.vlgmr.msra.gmra.mrb[0].mxu0 %vm169_vm6, %v105_v31 }
  0x8c   :  { %224 = vmatprep.mubr.bf16.mxu0 %v2244_v1  ;;  %529 = vmatpush1.bf16.msra.mxu0 %v2294_v7 }
  0x8d   :  { %530 = vmatprep.subr.bf16.mxu0 %v2306_v10 }
  0x90   :  { %531 = vmatpush1.bf16.msra.mxu0 %v2311_v11 }
  0x91   :  { %532 = vmatprep.subr.bf16.mxu0 %v2324_v14 }
  0x94   :  { %533 = vmatpush1.bf16.msra.mxu0 %v2329_v15 }
  0x95   :  { %534 = vmatprep.subr.bf16.mxu0 %v2343_v18 }
  0x98   :  { %535 = vmatpush1.bf16.msra.mxu0 %v2348_v19 }
  0x99   :  { %674 = vmatprep.subr.bf16.mxu0 %v2287_v6 }
  0xe7   :  { %v342_v32 = vpop.f32.mrb[0].mxu1 }
  0xe8   :  { %v344_v33 = vpop.f32.mrb[1].mxu1 }
  0xe9   :  { %v346_v34 = vpop.f32.mrb[2].mxu1  ;;  %v356_v45 = vadd.f32 %v344_v33, %v2393_v44 }
  0xea   :  { %v347_v35 = vpop.f32.mrb[3].mxu1 }
 0x15e   :  { %v216_v36 = vpop.f32.mrb[0].mxu0 }
 0x15f   :  { %v349_v37 = vadd.f32 %v342_v32, %v216_v36  ;;  %v218_v38 = vpop.f32.mrb[1].mxu0 }
 0x160   :  { %v220_v39 = vpop.f32.mrb[2].mxu0 }
 0x161   :  { %v1934_v40 = vmul.f32 -1.442695, %v349_v37  ;;  %v222_v41 = vpop.f32.mrb[3].mxu0 }
 0x163   :  { %2147 = vpow2.f32 %v1934_v40  ;;  %v20_v40 = vld [vmem:[%s2939_s0 + $0x28] sm:$0xff] }
 0x16d   :  { %v2148_v42 = vpop.eup %2147 }
 0x16e   :  { %v353_v43 = vadd.f32 1.0, %v2148_v42 }
 0x170   :  { %2149 = vrcp.f32 %v353_v43 }
 0x17a   :  { %v2150_v46 = vpop.eup %2149 }
 0x17b   :  { %v357_v47 = vmul.f32 %v2150_v46, %v356_v45  ;;  %v360_v50 = vsub.f32 1.0, %v2150_v46  ;;  %v366_v52 = vmul.f32 0.0, %v2150_v46 }
 0x17d   :  { %v358_v48 = vadd.f32 %v357_v47, %v218_v38 }
 0x17f   :  { %2151 = vtanh.f32 %v358_v48 }
 0x189   :  { %v2152_v49 = vpop.eup %2151 }
 0x18a   :  { %362 = vrot.lane.b32.xlu0 %v2152_v49, %s2246_s27 }
 0x1fc   :  { %v363_v51 = vpop.permute.xlu0 %362 }
 0x1fd   :  { %v365_v53 = vmul.f32 %v363_v51, %v360_v50 }
 0x1ff   :  { %v2397_v54 = vadd.f32 %v366_v52, %v365_v53 }
 0x201   :  { %v375_v55 = vpack.c.bf16 %v2397_v54, %v2397_v54  ;;  %374 = vst.msk [vmem:[#allocation2 + $0x38] sm:$0xff] %vm373_vm7, %v2397_v54 }
 0x203   :  { %377 = vrot.lane.b32.xlu1 %v375_v55, %s2246_s27 }
 0x207   :  { %32 = vperm.xlu1 %2063, %v17_v57  }
 0x20b   :  { %2064 = vset.pattern.permute.xlu1 %v2243_v0 }
 0x20c   :  { %64 = vperm.xlu1 %2064, %v17_v57   ;;  %v22_v57 = vld [vmem:[%s2939_s0 + $0x38] sm:$0xff] }
 0x210   :  { %2067 = vset.pattern.permute.xlu1 %v2244_v1 }
 0x275   :  { %v378_v56 = vpop.permute.xlu1 %377 }
 0x276   :  { %1935 = vmatmul.mubr.msk.bf16.vlgmr.msra.gmra.mrb[4].mxu1 %vm304_vm8, %v378_v56 }
 0x277   :  { %456 = vmatpush1.bf16.msra.mxu1 %v2294_v7  ;;  %487 = vmatprep.mubr.bf16.mxu1 %v2244_v1 }
 0x278   :  { %457 = vmatprep.subr.bf16.mxu1 %v2306_v10 }
 0x27b   :  { %458 = vmatpush1.bf16.msra.mxu1 %v2311_v11 }
 0x27c   :  { %459 = vmatprep.subr.bf16.mxu1 %v2324_v14 }
 0x27f   :  { %460 = vmatpush1.bf16.msra.mxu1 %v2329_v15 }
 0x280   :  { %461 = vmatprep.subr.bf16.mxu1 %v2343_v18 }
 0x283   :  { %462 = vmatpush1.bf16.msra.mxu1 %v2348_v19 }
 0x284   :  { %601 = vmatprep.subr.bf16.mxu1 %v2287_v6 }
 0x286   :  { %v33_v26 = vpop.permute.xlu1 %32 }
 0x287   :  { %vm51_vm9 = vcmp.eq.s32.totalorder %v2372_v23, %v33_v26 }
 0x28b   :  { %v65_v27 = vpop.permute.xlu1 %64 }
 0x28c   :  { %vm83_vm10 = vcmp.eq.s32.totalorder %v2372_v23, %v65_v27 }
 0x28d   :  { %vm91_vm11 = vmor %vm51_vm9, %vm83_vm10 }
 0x28e   :  { %v99_v31 = vsel %vm91_vm11, 1.0, %v2245_v28 }
 0x349   :  { %v416_v58 = vpop.f32.mrb[4].mxu1 }
 0x34a   :  { %v423_v59 = vadd.f32 %v416_v58, %v220_v39  ;;  %v418_v60 = vpop.f32.mrb[5].mxu1  ;;  %v19_v39 = vld [vmem:[%s2939_s0 + $0x20] sm:$0xff] }
 0x34b   :  { %v420_v61 = vpop.f32.mrb[6].mxu1  ;;  %v430_v4 = vadd.f32 %v418_v60, %v2393_v44 }
 0x34c   :  { %v1936_v62 = vmul.f32 -1.442695, %v423_v59  ;;  %v421_v63 = vpop.f32.mrb[7].mxu1 }
 0x34e   :  { %2153 = vpow2.f32 %v1936_v62 }
 0x358   :  { %v2154_v2 = vpop.eup %2153 }
 0x359   :  { %v427_v3 = vadd.f32 1.0, %v2154_v2 }
 0x35b   :  { %2155 = vrcp.f32 %v427_v3 }
 0x365   :  { %v2156_v5 = vpop.eup %2155 }
 0x366   :  { %v431_v8 = vmul.f32 %v2156_v5, %v430_v4  ;;  %v434_v16 = vsub.f32 1.0, %v2156_v5  ;;  %v440_v20 = vmul.f32 %v2156_v5, %v2397_v54 }
 0x368   :  { %v432_v9 = vadd.f32 %v431_v8, %v222_v41  ;;  %v21_v41 = vld [vmem:[%s2939_s0 + $0x30] sm:$0xff] }
 0x36a   :  { %2157 = vtanh.f32 %v432_v9 }
 0x374   :  { %v2158_v12 = vpop.eup %2157 }
 0x375   :  { %436 = vrot.lane.b32.xlu0 %v2158_v12, %s2246_s27 }
 0x379   :  { %35 = vperm.xlu0 %2061, %v18_v13  }
 0x37d   :  { %2065 = vset.pattern.permute.xlu0 %v2243_v0 }
 0x37e   :  { %67 = vperm.xlu0 %2065, %v18_v13  }
 0x382   :  { %2066 = vset.pattern.permute.xlu0 %v2244_v1 }
 0x383   :  { %38 = vperm.xlu0 %2066, %v19_v39  }
 0x387   :  { %2069 = vset.pattern.permute.xlu0 %v2243_v0 }
 0x388   :  { %73 = vperm.xlu0 %2069, %v20_v40  }
 0x38c   :  { %76 = vperm.xlu0 %2069, %v21_v41  }
 0x3e7   :  { %v437_v17 = vpop.permute.xlu0 %436 }
 0x3e8   :  { %v439_v21 = vmul.f32 %v437_v17, %v434_v16 }
 0x3ea   :  { %v2427_v24 = vadd.f32 %v440_v20, %v439_v21 }
 0x3ec   :  { %v448_v25 = vpack.c.bf16 %v2427_v24, %v2427_v24  ;;  %447 = vst.msk [vmem:[#allocation2 + $0x30] sm:$0xff] %vm373_vm7, %v2427_v24 }
 0x3ee   :  { %450 = vrot.lane.b32.xlu1 %v448_v25, %s2246_s27 }
 0x3f8   :  { %v36_v29 = vpop.permute.xlu0 %35 }
 0x3f9   :  { %vm52_vm12 = vcmp.eq.s32.totalorder %v2372_v23, %v36_v29 }
 0x3fd   :  { %v68_v30 = vpop.permute.xlu0 %67 }
 0x3fe   :  { %vm84_vm13 = vcmp.eq.s32.totalorder %v2372_v23, %v68_v30 }
 0x3ff   :  { %vm92_vm14 = vmor %vm52_vm12, %vm84_vm13 }
 0x400   :  { %v100_v32 = vsel %vm92_vm14, 1.0, %v2245_v28 }
 0x401   :  { %v106_v33 = vpack.c.bf16 %v100_v32, %v99_v31 }
 0x402   :  { %v39_v2 = vpop.permute.xlu0 %38 }
 0x403   :  { %1923 = vmatmul.mubr.msk.bf16.gmra.mrb[4].mxu0 %vm169_vm6, %v106_v33  ;;  %vm53_vm2 = vcmp.eq.s32.totalorder %v2372_v23, %v39_v2 }
 0x404   :  { %234 = vmatprep.mubr.bf16.mxu0 %v2244_v1 }
 0x407   :  { %v74_v3 = vpop.permute.xlu0 %73 }
 0x408   :  { %vm86_vm15 = vcmp.eq.s32.totalorder %v2372_v23, %v74_v3 }
 0x40b   :  { %v77_v13 = vpop.permute.xlu0 %76 }
 0x40c   :  { %vm87_vm9 = vcmp.eq.s32.totalorder %v2372_v23, %v77_v13 }
 0x460   :  { %v451_v34 = vpop.permute.xlu1 %450 }
 0x461   :  { %1937 = vmatmul.mubr.msk.bf16.vlgmr.msra.gmra.mrb[8].mxu1 %vm304_vm8, %v451_v34 }
 0x462   :  { %602 = vmatpush1.bf16.msra.mxu1 %v2294_v7  ;;  %633 = vmatprep.mubr.bf16.mxu1 %v2244_v1 }
 0x463   :  { %603 = vmatprep.subr.bf16.mxu1 %v2306_v10 }
 0x466   :  { %604 = vmatpush1.bf16.msra.mxu1 %v2311_v11 }
 0x467   :  { %605 = vmatprep.subr.bf16.mxu1 %v2324_v14 }
 0x46a   :  { %606 = vmatpush1.bf16.msra.mxu1 %v2329_v15 }
 0x46b   :  { %607 = vmatprep.subr.bf16.mxu1 %v2343_v18 }
 0x46e   :  { %608 = vmatpush1.bf16.msra.mxu1 %v2348_v19 }
 0x46f   :  { %747 = vmatprep.subr.bf16.mxu1 %v2287_v6 }
 0x4d6   :  { %v226_v35 = vpop.f32.mrb[4].mxu0 }
 0x4d7   :  { %v228_v36 = vpop.f32.mrb[5].mxu0 }
 0x4d8   :  { %v2452_v37 = vpop.f32.mrb[6].mxu0 }
 0x4d9   :  { %v2454_v38 = vpop.f32.mrb[7].mxu0 }
 0x534   :  { %v489_v42 = vpop.f32.mrb[8].mxu1 }
 0x535   :  { %v496_v43 = vadd.f32 %v489_v42, %v226_v35  ;;  %v491_v45 = vpop.f32.mrb[9].mxu1 }
 0x536   :  { %v493_v46 = vpop.f32.mrb[10].mxu1  ;;  %v503_v51 = vadd.f32 %v491_v45, %v2393_v44 }
 0x537   :  { %v1938_v47 = vmul.f32 -1.442695, %v496_v43  ;;  %v494_v48 = vpop.f32.mrb[11].mxu1 }
 0x539   :  { %2159 = vpow2.f32 %v1938_v47 }
 0x543   :  { %v2160_v49 = vpop.eup %2159 }
 0x544   :  { %v500_v50 = vadd.f32 1.0, %v2160_v49 }
 0x546   :  { %2161 = vrcp.f32 %v500_v50 }
 0x550   :  { %v2162_v52 = vpop.eup %2161 }
 0x551   :  { %v504_v53 = vmul.f32 %v2162_v52, %v503_v51  ;;  %v507_v58 = vsub.f32 1.0, %v2162_v52  ;;  %v513_v60 = vmul.f32 %v2162_v52, %v2427_v24 }
 0x553   :  { %v505_v55 = vadd.f32 %v504_v53, %v228_v36 }
 0x555   :  { %2163 = vtanh.f32 %v505_v55 }
 0x55f   :  { %v2164_v56 = vpop.eup %2163 }
 0x560   :  { %509 = vrot.lane.b32.xlu1 %v2164_v56, %s2246_s27 }
 0x564   :  { %41 = vperm.xlu1 %2067, %v20_v40  }
 0x568   :  { %2068 = vset.pattern.permute.xlu1 %v2243_v0 }
 0x569   :  { %70 = vperm.xlu1 %2068, %v19_v39  }
 0x56d   :  { %2070 = vset.pattern.permute.xlu1 %v2244_v1 }
 0x56e   :  { %44 = vperm.xlu1 %2070, %v21_v41  }
 0x572   :  { %47 = vperm.xlu1 %2070, %v22_v57  }
 0x576   :  { %2071 = vset.pattern.permute.xlu1 %v2243_v0 }
 0x577   :  { %79 = vperm.xlu1 %2071, %v22_v57  }
 0x5d2   :  { %v510_v59 = vpop.permute.xlu1 %509 }
 0x5d3   :  { %v512_v61 = vmul.f32 %v510_v59, %v507_v58 }
 0x5d5   :  { %v2475_v62 = vadd.f32 %v513_v60, %v512_v61 }
 0x5d7   :  { %v521_v63 = vpack.c.bf16 %v2475_v62, %v2475_v62  ;;  %520 = vst.msk [vmem:[#allocation2 + $0x28] sm:$0xff] %vm373_vm7, %v2475_v62 }
 0x5d9   :  { %523 = vrot.lane.b32.xlu0 %v521_v63, %s2246_s27 }
 0x5e3   :  { %v42_v4 = vpop.permute.xlu1 %41 }
 0x5e4   :  { %vm54_vm0 = vcmp.eq.s32.totalorder %v2372_v23, %v42_v4 }
 0x5e5   :  { %vm94_vm1 = vmor %vm54_vm0, %vm86_vm15 }
 0x5e6   :  { %v102_v5 = vsel %vm94_vm1, 1.0, %v2245_v28 }
 0x5e8   :  { %v71_v0 = vpop.permute.xlu1 %70 }
 0x5e9   :  { %vm85_vm3 = vcmp.eq.s32.totalorder %v2372_v23, %v71_v0 }
 0x5ea   :  { %vm93_vm4 = vmor %vm53_vm2, %vm85_vm3 }
 0x5eb   :  { %v101_v8 = vsel %vm93_vm4, 1.0, %v2245_v28 }
 0x5ec   :  { %v107_v9 = vpack.c.bf16 %v102_v5, %v101_v8 }
 0x5ed   :  { %v45_v12 = vpop.permute.xlu1 %44 }
 0x5ee   :  { %1924 = vmatmul.mubr.msk.bf16.gmra.mrb[8].mxu0 %vm169_vm6, %v107_v9  ;;  %vm55_vm5 = vcmp.eq.s32.totalorder %v2372_v23, %v45_v12 }
 0x5ef   :  { %244 = vmatprep.mubr.bf16.mxu0 %v2244_v1  ;;  %vm95_vm10 = vmor %vm55_vm5, %vm87_vm9 }
 0x5f0   :  { %v103_v20 = vsel %vm95_vm10, 1.0, %v2245_v28 }
 0x5f1   :  { %v48_v16 = vpop.permute.xlu1 %47 }
 0x5f2   :  { %vm56_vm11 = vcmp.eq.s32.totalorder %v2372_v23, %v48_v16 }
 0x5f6   :  { %v80_v17 = vpop.permute.xlu1 %79 }
 0x5f7   :  { %vm88_vm12 = vcmp.eq.s32.totalorder %v2372_v23, %v80_v17 }
 0x5f8   :  { %vm96_vm13 = vmor %vm56_vm11, %vm88_vm12 }
 0x5f9   :  { %v104_v21 = vsel %vm96_vm13, 1.0, %v2245_v28 }
 0x5fa   :  { %v108_v25 = vpack.c.bf16 %v104_v21, %v103_v20 }
 0x5fc   :  { %1925 = vmatmul.mubr.msk.bf16.gmra.mrb[12].mxu0 %vm169_vm6, %v108_v25  ;;  %vm2248_vm6 = vmmov 0  }
 0x5fd   :  { %560 = vmatprep.mubr.bf16.mxu0 %v2244_v1 }
 0x64b   :  { %v524_v26 = vpop.permute.xlu0 %523 }
 0x64c   :  { %1939 = vmatmul.mubr.msk.bf16.vlgmr.msra.gmra.mrb[16].mxu0 %vm304_vm8, %v524_v26 }
 0x64d   :  { %675 = vmatpush1.bf16.msra.mxu0 %v2294_v7  ;;  %706 = vmatprep.mubr.bf16.mxu0 %v2244_v1 }
 0x64e   :  { %676 = vmatprep.subr.bf16.mxu0 %v2306_v10 }
 0x651   :  { %677 = vmatpush1.bf16.msra.mxu0 %v2311_v11 }
 0x652   :  { %678 = vmatprep.subr.bf16.mxu0 %v2324_v14 }
 0x655   :  { %679 = vmatpush1.bf16.msra.mxu0 %v2329_v15 }
 0x656   :  { %680 = vmatprep.subr.bf16.mxu0 %v2343_v18 }
 0x659   :  { %681 = vmatpush1.bf16.msra.mxu0 %v2348_v19 }
 0x65a   :  { %820 = vmatprep.subr.bf16.mxu0 %v2287_v6 }
 0x6c1   :  { %v236_v23 = vpop.f32.mrb[8].mxu0 }
 0x6c2   :  { %v238_v27 = vpop.f32.mrb[9].mxu0 }
 0x6c3   :  { %v2508_v29 = vpop.f32.mrb[10].mxu0 }
 0x6c4   :  { %v2510_v30 = vpop.f32.mrb[11].mxu0 }
 0x6cf   :  { %v2512_v31 = vpop.f32.mrb[12].mxu0 }
 0x6d0   :  { %v2514_v32 = vpop.f32.mrb[13].mxu0 }
 0x6d1   :  { %v2516_v33 = vpop.f32.mrb[14].mxu0 }
 0x6d2   :  { %v2518_v34 = vpop.f32.mrb[15].mxu0 }
 0x71f   :  { %v562_v35 = vpop.f32.mrb[16].mxu0 }
 0x720   :  { %v569_v36 = vadd.f32 %v562_v35, %v2452_v37  ;;  %v564_v39 = vpop.f32.mrb[17].mxu0 }
 0x721   :  { %v566_v40 = vpop.f32.mrb[18].mxu0  ;;  %v576_v45 = vadd.f32 %v564_v39, %v2393_v44 }
 0x722   :  { %v1940_v6 = vmul.f32 -1.442695, %v569_v36  ;;  %v567_v41 = vpop.f32.mrb[19].mxu0 }
 0x724   :  { %2165 = vpow2.f32 %v1940_v6 }
 0x72e   :  { %v2166_v42 = vpop.eup %2165 }
 0x72f   :  { %v573_v43 = vadd.f32 1.0, %v2166_v42 }
 0x731   :  { %2167 = vrcp.f32 %v573_v43 }
 0x73b   :  { %v2168_v46 = vpop.eup %2167 }
 0x73c   :  { %v577_v47 = vmul.f32 %v2168_v46, %v576_v45  ;;  %v580_v50 = vsub.f32 1.0, %v2168_v46  ;;  %v586_v51 = vmul.f32 %v2168_v46, %v2475_v62 }
 0x73e   :  { %v578_v48 = vadd.f32 %v577_v47, %v2454_v38 }
 0x740   :  { %2169 = vtanh.f32 %v578_v48 }
 0x74a   :  { %v2170_v49 = vpop.eup %2169 }
 0x74b   :  { %582 = vrot.lane.b32.xlu1 %v2170_v49, %s2246_s27 }
 0x7bd   :  { %v583_v37 = vpop.permute.xlu1 %582 }
 0x7be   :  { %v585_v52 = vmul.f32 %v583_v37, %v580_v50 }
 0x7c0   :  { %v2525_v53 = vadd.f32 %v586_v51, %v585_v52 }
 0x7c2   :  { %v594_v55 = vpack.c.bf16 %v2525_v53, %v2525_v53  ;;  %593 = vst.msk [vmem:[#allocation2 + $0x20] sm:$0xff] %vm373_vm7, %v2525_v53 }
 0x7c4   :  { %596 = vrot.lane.b32.xlu0 %v594_v55, %s2246_s27 }
 0x836   :  { %v597_v38 = vpop.permute.xlu0 %596 }
 0x837   :  { %1941 = vmatmul.mubr.msk.bf16.vlgmr.msra.gmra.mrb[12].mxu1 %vm304_vm8, %v597_v38 }
 0x838   :  { %748 = vmatpush1.bf16.msra.mxu1 %v2294_v7  ;;  %779 = vmatprep.mubr.bf16.mxu1 %v2244_v1 }
 0x839   :  { %749 = vmatprep.subr.bf16.mxu1 %v2306_v10 }
 0x83c   :  { %750 = vmatpush1.bf16.msra.mxu1 %v2311_v11 }
 0x83d   :  { %751 = vmatprep.subr.bf16.mxu1 %v2324_v14 }
 0x840   :  { %752 = vmatpush1.bf16.msra.mxu1 %v2329_v15 }
 0x841   :  { %753 = vmatprep.subr.bf16.mxu1 %v2343_v18 }
 0x844   :  { %754 = vmatpush1.bf16.msra.mxu1 %v2348_v19 }
 0x90a   :  { %v635_v56 = vpop.f32.mrb[12].mxu1 }
 0x90b   :  { %v642_v57 = vadd.f32 %v635_v56, %v236_v23  ;;  %v637_v58 = vpop.f32.mrb[13].mxu1 }
 0x90c   :  { %v639_v59 = vpop.f32.mrb[14].mxu1  ;;  %v649_v3 = vadd.f32 %v637_v58, %v2393_v44 }
 0x90d   :  { %v1942_v60 = vmul.f32 -1.442695, %v642_v57  ;;  %v640_v61 = vpop.f32.mrb[15].mxu1 }
 0x90f   :  { %2171 = vpow2.f32 %v1942_v60 }
 0x919   :  { %v2172_v63 = vpop.eup %2171 }
 0x91a   :  { %v646_v2 = vadd.f32 1.0, %v2172_v63 }
 0x91c   :  { %2173 = vrcp.f32 %v646_v2  ;;  %v2099_v2 = vld [vmem:[%s2940_s1 + $0x90] ss:$8 sps:$4 sm:$0xff]  }
 0x926   :  { %v2174_v4 = vpop.eup %2173 }
 0x927   :  { %v650_v0 = vmul.f32 %v2174_v4, %v649_v3  ;;  %v653_v9 = vsub.f32 1.0, %v2174_v4  ;;  %v659_v13 = vmul.f32 %v2174_v4, %v2525_v53  ;;  %v2101_v3 = vld [vmem:[%s2940_s1 + $0x94] ss:$8 sps:$4 sm:$0xff]  }
 0x928   :  { %1006 = vmatprep.subr.bf16.mxu1 %v2101_v3  ;;  %v2597_v4 = vld [vmem:[%s2940_s1 + $0x114] ss:$8 sps:$4 sm:$0xff]  }
 0x929   :  { %v651_v5 = vadd.f32 %v650_v0, %v238_v27  ;;  %v2102_v0 = vld [vmem:[%s2940_s1 + $0xa0] ss:$8 sps:$4 sm:$0xff]  }
 0x92b   :  { %2175 = vtanh.f32 %v651_v5  ;;  %v2605_v5 = vld [vmem:[%s2940_s1 + $0x110] ss:$8 sps:$4 sm:$0xff]  }
 0x935   :  { %v2176_v8 = vpop.eup %2175 }
 0x936   :  { %655 = vrot.lane.b32.xlu1 %v2176_v8, %s2246_s27  ;;  %v2107_v8 = vld [vmem:[%s2940_s1 + $0xb4] ss:$8 sps:$4 sm:$0xff]  }
 0x9a8   :  { %v656_v12 = vpop.permute.xlu1 %655 }
 0x9a9   :  { %v658_v16 = vmul.f32 %v656_v12, %v653_v9  ;;  %v2105_v9 = vld [vmem:[%s2940_s1 + $0xb0] ss:$8 sps:$4 sm:$0xff]   ;;  %v2110_v12 = vld [vmem:[%s2940_s1 + $0xc4] ss:$8 sps:$4 sm:$0xff]  }
 0x9ab   :  { %v2544_v17 = vadd.f32 %v659_v13, %v658_v16  ;;  %v2108_v13 = vld [vmem:[%s2940_s1 + $0xc0] ss:$8 sps:$4 sm:$0xff]   ;;  %v2115_v16 = vld [vmem:[%s2940_s1 + $0xd4] ss:$8 sps:$4 sm:$0xff]  }
 0x9ad   :  { %v667_v20 = vpack.c.bf16 %v2544_v17, %v2544_v17 }
 0x9af   :  { %669 = vrot.lane.b32.xlu0 %v667_v20, %s2246_s27  ;;  %v2113_v20 = vld [vmem:[%s2940_s1 + $0xd0] ss:$8 sps:$4 sm:$0xff]  }
 0xa21   :  { %v670_v21 = vpop.permute.xlu0 %669 }
 0xa22   :  { %1943 = vmatmul.mubr.msk.bf16.vlgmr.msra.gmra.mrb[20].mxu0 %vm304_vm8, %v670_v21 }
 0xa23   :  { %821 = vmatpush1.bf16.msra.mxu0 %v2294_v7  ;;  %852 = vmatprep.mubr.bf16.mxu0 %v2244_v1 }
 0xa24   :  { %822 = vmatprep.subr.bf16.mxu0 %v2306_v10 }
 0xa27   :  { %823 = vmatpush1.bf16.msra.mxu0 %v2311_v11 }
 0xa28   :  { %824 = vmatprep.subr.bf16.mxu0 %v2324_v14 }
 0xa2b   :  { %825 = vmatpush1.bf16.msra.mxu0 %v2329_v15 }
 0xa2c   :  { %826 = vmatprep.subr.bf16.mxu0 %v2343_v18 }
 0xa2f   :  { %827 = vmatpush1.bf16.msra.mxu0 %v2348_v19 }
 0xa30   :  { %1128 = vmatprep.subr.bf16.mxu0 %v2597_v4 }
 0xaf5   :  { %v708_v25 = vpop.f32.mrb[20].mxu0 }
 0xaf6   :  { %v715_v26 = vadd.f32 %v708_v25, %v2508_v29  ;;  %v710_v23 = vpop.f32.mrb[21].mxu0 }
 0xaf7   :  { %v712_v27 = vpop.f32.mrb[22].mxu0  ;;  %v722_v11 = vadd.f32 %v710_v23, %v2393_v44 }
 0xaf8   :  { %v1944_v7 = vmul.f32 -1.442695, %v715_v26  ;;  %v713_v35 = vpop.f32.mrb[23].mxu0 }
 0xafa   :  { %2177 = vpow2.f32 %v1944_v7 }
 0xb04   :  { %v2178_v36 = vpop.eup %2177 }
 0xb05   :  { %v719_v10 = vadd.f32 1.0, %v2178_v36 }
 0xb07   :  { %2179 = vrcp.f32 %v719_v10 }
 0xb11   :  { %v2180_v14 = vpop.eup %2179 }
 0xb12   :  { %v723_v39 = vmul.f32 %v2180_v14, %v722_v11  ;;  %v726_v19 = vsub.f32 1.0, %v2180_v14  ;;  %v732_v40 = vmul.f32 %v2180_v14, %v2544_v17 }
 0xb14   :  { %v724_v15 = vadd.f32 %v723_v39, %v2510_v30 }
 0xb16   :  { %2181 = vtanh.f32 %v724_v15  ;;  %v2633_v15 = vld [vmem:[%s2940_s1 + $0x124] ss:$8 sps:$4 sm:$0xff]  }
 0xb20   :  { %v2182_v18 = vpop.eup %2181 }
 0xb21   :  { %728 = vrot.lane.b32.xlu1 %v2182_v18, %s2246_s27  ;;  %v2641_v18 = vld [vmem:[%s2940_s1 + $0x120] ss:$8 sps:$4 sm:$0xff]  }
 0xb93   :  { %v729_v29 = vpop.permute.xlu1 %728 }
 0xb94   :  { %v731_v6 = vmul.f32 %v729_v29, %v726_v19  ;;  %v2125_v19 = vld [vmem:[%s2940_s1 + $0xf0] ss:$8 sps:$4 sm:$0xff]   ;;  %v2127_v29 = vld [vmem:[%s2940_s1 + $0xf4] ss:$8 sps:$4 sm:$0xff]  }
 0xb96   :  { %v2563_v41 = vadd.f32 %v732_v40, %v731_v6  ;;  %v2662_v40 = vld [vmem:[%s2940_s1 + $0x130] ss:$8 sps:$4 sm:$0xff]   ;;  %v2668_v6 = vld [vmem:[%s2940_s1 + $0x144] ss:$8 sps:$4 sm:$0xff]  }
 0xb98   :  { %v740_v42 = vpack.c.bf16 %v2563_v41, %v2563_v41 }
 0xb9a   :  { %742 = vrot.lane.b32.xlu0 %v740_v42, %s2246_s27  ;;  %v2133_v42 = vld [vmem:[%s2940_s1 + $0x104] ss:$8 sps:$4 sm:$0xff]  }
 0xc0c   :  { %v743_v43 = vpop.permute.xlu0 %742 }
 0xc0d   :  { %1945 = vmatmul.mubr.msk.bf16.vlgmr.msra.gmra.mrb[16].mxu1 %vm304_vm8, %v743_v43  ;;  %v2677_v43 = vld [vmem:[%s2940_s1 + $0x140] ss:$8 sps:$4 sm:$0xff]  }
 0xc0e   :  { %1038 = vmatprep.mubr.bf16.mxu1 %v2244_v1  ;;  %1007 = vmatpush1.bf16.msra.mxu1 %v2099_v2 }
 0xce0   :  { %v781_v30 = vpop.f32.mrb[16].mxu1 }
 0xce1   :  { %v788_v45 = vadd.f32 %v781_v30, %v2512_v31  ;;  %v783_v46 = vpop.f32.mrb[17].mxu1  ;;  %v2131_v30 = vld [vmem:[%s2940_s1 + $0x100] ss:$8 sps:$4 sm:$0xff]  }
 0xce2   :  { %v785_v47 = vpop.f32.mrb[18].mxu1  ;;  %v795_v51 = vadd.f32 %v783_v46, %v2393_v44 }
 0xce3   :  { %v1946_v48 = vmul.f32 -1.442695, %v788_v45  ;;  %v786_v49 = vpop.f32.mrb[19].mxu1 }
 0xce5   :  { %2183 = vpow2.f32 %v1946_v48 }
 0xcef   :  { %v2184_v50 = vpop.eup %2183 }
 0xcf0   :  { %v792_v37 = vadd.f32 1.0, %v2184_v50 }
 0xcf2   :  { %2185 = vrcp.f32 %v792_v37 }
 0xcfc   :  { %v2186_v52 = vpop.eup %2185 }
 0xcfd   :  { %v796_v55 = vmul.f32 %v2186_v52, %v795_v51  ;;  %v799_v57 = vsub.f32 1.0, %v2186_v52  ;;  %v805_v58 = vmul.f32 %v2186_v52, %v2563_v41 }
 0xcff   :  { %v797_v38 = vadd.f32 %v796_v55, %v2514_v32 }
 0xd01   :  { %2187 = vtanh.f32 %v797_v38 }
 0xd0b   :  { %v2188_v56 = vpop.eup %2187 }
 0xd0c   :  { %801 = vrot.lane.b32.xlu1 %v2188_v56, %s2246_s27 }
 0xd7e   :  { %v802_v31 = vpop.permute.xlu1 %801 }
 0xd7f   :  { %v804_v59 = vmul.f32 %v802_v31, %v799_v57  ;;  %v917_v31 = vshrl.u32 %v23_v22, 7 }
 0xd81   :  { %v2575_v60 = vadd.f32 %v805_v58, %v804_v59  ;;  %v918_v58 = vsub.s32 0, %v917_v31  ;;  %v914_v59 = vld [vmem:[%s2941_s2] ss:$8 sm:$0x3]  ;;  %v922_v22 = vsub.s32 1, %v917_v31 }
 0xd83   :  { %v813_v61 = vpack.c.bf16 %v2575_v60, %v2575_v60 }
 0xd85   :  { %815 = vrot.lane.b32.xlu0 %v813_v61, %s2246_s27  ;;  %v2720_v61 = vrot.slane %v914_v59, %v918_v58 }
 0xd89   :  { %369 = vrot.lane.b32.xlu0 %v2397_v54, %s2246_s27  ;;  %v2104_v54 = vld [vmem:[%s2940_s1 + $0xa4] ss:$8 sps:$4 sm:$0xff]  }
 0xd8a   :  { %1008 = vmatprep.subr.bf16.mxu1 %v2104_v54 }
 0xd8b   :  { %1009 = vmatpush1.bf16.msra.mxu1 %v2102_v0 }
 0xd8c   :  { %1010 = vmatprep.subr.bf16.mxu1 %v2107_v8 }
 0xd8f   :  { %1011 = vmatpush1.bf16.msra.mxu1 %v2105_v9 }
 0xd90   :  { %1012 = vmatprep.subr.bf16.mxu1 %v2110_v12 }
 0xd93   :  { %1013 = vmatpush1.bf16.msra.mxu1 %v2108_v13  ;;  %v2726_v13 = vld [vmem:[%s2941_s2 + $0x2] ss:$0 sm:$0xff] }
 0xd94   :  { %1014 = vmatprep.subr.bf16.mxu1 %v2115_v16  ;;  %v2728_v16 = vrot.slane %v914_v59, %v922_v22 }
 0xd97   :  { %1015 = vmatpush1.bf16.msra.mxu1 %v2113_v20 }
 0xdf7   :  { %v816_v32 = vpop.permute.xlu0 %815 }
 0xdf8   :  { %1947 = vmatmul.mubr.msk.bf16.vlgmr.msra.gmra.mrb[24].mxu0 %vm304_vm8, %v816_v32 }
 0xdf9   :  { %1160 = vmatprep.mubr.bf16.mxu0 %v2244_v1  ;;  %1129 = vmatpush1.bf16.msra.mxu0 %v2605_v5 }
 0xdfa   :  { %1130 = vmatprep.subr.bf16.mxu0 %v2633_v15 }
 0xdfb   :  { %v370_v63 = vpop.permute.xlu0 %369 }
 0xdfc   :  { %372 = vst.msk [vmem:[#allocation2] sm:$0xff] %vm304_vm8, %v370_v63 }
 0xdfd   :  { %1131 = vmatpush1.bf16.msra.mxu0 %v2641_v18 }
 0xecb   :  { %v854_v21 = vpop.f32.mrb[24].mxu0 }
 0xecc   :  { %v861_v25 = vadd.f32 %v854_v21, %v2516_v33  ;;  %v856_v26 = vpop.f32.mrb[25].mxu0  ;;  %v2121_v33 = vld [vmem:[%s2940_s1 + $0xe4] ss:$8 sps:$4 sm:$0xff]  }
 0xecd   :  { %v858_v23 = vpop.f32.mrb[26].mxu0  ;;  %v868_v10 = vadd.f32 %v856_v26, %v2393_v44  ;;  %v2119_v44 = vld [vmem:[%s2940_s1 + $0xe0] ss:$8 sps:$4 sm:$0xff]   ;;  %1016 = vmatprep.subr.bf16.mxu1 %v2121_v33 }
 0xece   :  { %v1948_v27 = vmul.f32 -1.442695, %v861_v25  ;;  %v859_v7 = vpop.f32.mrb[27].mxu0  ;;  %1017 = vmatpush1.bf16.msra.mxu1 %v2119_v44 }
 0xecf   :  { %1018 = vmatprep.subr.bf16.mxu1 %v2127_v29 }
 0xed0   :  { %2189 = vpow2.f32 %v1948_v27 }
 0xed2   :  { %1019 = vmatpush1.bf16.msra.mxu1 %v2125_v19 }
 0xed3   :  { %1020 = vmatprep.subr.bf16.mxu1 %v2133_v42 }
 0xed6   :  { %1021 = vmatpush1.bf16.msra.mxu1 %v2131_v30 }
 0xed7   :  { %1329 = vmatprep.subr.bf16.mxu1 %v2597_v4 }
 0xeda   :  { %v2190_v35 = vpop.eup %2189 }
 0xedb   :  { %v865_v36 = vadd.f32 1.0, %v2190_v35 }
 0xedd   :  { %2191 = vrcp.f32 %v865_v36 }
 0xee7   :  { %v2192_v11 = vpop.eup %2191 }
 0xee8   :  { %v869_v14 = vmul.f32 %v2192_v11, %v868_v10  ;;  %v872_v46 = vsub.f32 1.0, %v2192_v11  ;;  %v878_v48 = vmul.f32 %v2192_v11, %v2575_v60 }
 0xeea   :  { %v870_v39 = vadd.f32 %v869_v14, %v2518_v34  ;;  %v2651_v34 = vld [vmem:[%s2940_s1 + $0x134] ss:$8 sps:$4 sm:$0xff]  }
 0xeeb   :  { %1132 = vmatprep.subr.bf16.mxu0 %v2651_v34 }
 0xeec   :  { %2193 = vtanh.f32 %v870_v39  ;;  %1133 = vmatpush1.bf16.msra.mxu0 %v2662_v40 }
 0xeed   :  { %1134 = vmatprep.subr.bf16.mxu0 %v2668_v6 }
 0xef0   :  { %1135 = vmatpush1.bf16.msra.mxu0 %v2677_v43 }
 0xef1   :  { %1195 = vmatprep.subr.bf16.mxu0 %v2597_v4 }
 0xef3   :  { %1161 = vmatmul.mubr.bf16.vlgmr.msra.gmra.mrb[28].mxu0 %v2244_v1 }
 0xef4   :  { %1196 = vmatpush1.bf16.msra.mxu0 %v2605_v5  ;;  %1227 = vmatprep.mubr.bf16.mxu0 %v2244_v1 }
 0xef5   :  { %1197 = vmatprep.subr.bf16.mxu0 %v2633_v15 }
 0xef6   :  { %v2194_v45 = vpop.eup %2193 }
 0xef7   :  { %874 = vrot.lane.b32.xlu1 %v2194_v45, %s2246_s27 }
 0xef8   :  { %1198 = vmatpush1.bf16.msra.mxu0 %v2641_v18 }
 0xef9   :  { %1199 = vmatprep.subr.bf16.mxu0 %v2651_v34 }
 0xefb   :  { %443 = vrot.lane.b32.xlu1 %v2427_v24, %s2246_s27 }
 0xefc   :  { %1200 = vmatpush1.bf16.msra.mxu0 %v2662_v40 }
 0xefd   :  { %1201 = vmatprep.subr.bf16.mxu0 %v2668_v6 }
 0xf00   :  { %1202 = vmatpush1.bf16.msra.mxu0 %v2677_v43 }
 0xf01   :  { %1262 = vmatprep.subr.bf16.mxu0 %v2597_v4 }
 0xf69   :  { %v875_v47 = vpop.permute.xlu1 %874 }
 0xf6a   :  { %v877_v49 = vmul.f32 %v875_v47, %v872_v46 }
 0xf6c   :  { %v2700_v50 = vadd.f32 %v878_v48, %v877_v49 }
 0xf6d   :  { %v444_v24 = vpop.permute.xlu1 %443 }
 0xf6e   :  { %885 = vst.msk [vmem:[#allocation2] sm:$0xff] %vm373_vm7, %v2700_v50 }
 0xf6f   :  { %446 = vst.msk [vmem:[#allocation2 + $0x8] sm:$0xff] %vm304_vm8, %v444_v24 }
 0xf70   :  { %812 = vst.msk [vmem:[#allocation2 + $0x8] sm:$0xff] %vm373_vm7, %v2575_v60 }
 0xf75   :  { %v886_v37 = vld [vmem:[#allocation2] sm:$0xff] }
 0xf77   :  { %v887_v51 = vld [vmem:[#allocation2 + $0x8] sm:$0xff] }
 0xf78   :  { %v894_v52 = vpack.c.bf16 %v887_v51, %v886_v37 }
 0xf7a   :  { %1039 = vmatmul.mubr.bf16.vlgmr.msra.gmra.mrb[20].mxu1 %v894_v52 }
 0xf7b   :  { %1048 = vmatprep.mubr.bf16.mxu1 %v2244_v1  ;;  %1330 = vmatpush1.bf16.msra.mxu1 %v2605_v5 }
 0xf7c   :  { %1331 = vmatprep.subr.bf16.mxu1 %v2633_v15 }
 0xf7f   :  { %1332 = vmatpush1.bf16.msra.mxu1 %v2641_v18 }
 0xf80   :  { %1333 = vmatprep.subr.bf16.mxu1 %v2651_v34 }
 0xf83   :  { %1334 = vmatpush1.bf16.msra.mxu1 %v2662_v40 }
 0xf84   :  { %1335 = vmatprep.subr.bf16.mxu1 %v2668_v6 }
 0xf87   :  { %1336 = vmatpush1.bf16.msra.mxu1 %v2677_v43 }
 0xf88   :  { %1463 = vmatprep.subr.bf16.mxu1 %v2597_v4 }
 0xfc6   :  { %v1162_v55 = vpop.f32.mrb[28].mxu0 }
 0xfc7   :  { %v1164_v38 = vpop.f32.mrb[29].mxu0 }
 0xfc8   :  { %v1166_v56 = vpop.f32.mrb[30].mxu0  ;;  %v1176_v20 = vadd.f32 %v1164_v38, %v2726_v13 }
 0xfc9   :  { %v1167_v57 = vpop.f32.mrb[31].mxu0 }
0x104d   :  { %v1040_v32 = vpop.f32.mrb[20].mxu1 }
0x104e   :  { %v1041_v63 = vadd.f32 %v1040_v32, %v2720_v61  ;;  %v1042_v2 = vpop.f32.mrb[21].mxu1 }
0x104f   :  { %v1044_v3 = vpop.f32.mrb[22].mxu1  ;;  %v1043_v26 = vadd.f32 %v1042_v2, %v2728_v16 }
0x1050   :  { %v1169_v54 = vadd.f32 %v1162_v55, %v1041_v63  ;;  %v1046_v0 = vpop.f32.mrb[23].mxu1 }
0x1051   :  { %v1047_v24 = vadd.f32 %v1046_v0, %v2728_v16 }
0x1052   :  { %v1973_v8 = vmul.f32 -1.442695, %v1169_v54 }
0x1054   :  { %2195 = vpow2.f32 %v1973_v8 }
0x105e   :  { %v2196_v9 = vpop.eup %2195 }
0x105f   :  { %v1173_v12 = vadd.f32 1.0, %v2196_v9 }
0x1061   :  { %2197 = vrcp.f32 %v1173_v12 }
0x106b   :  { %v2198_v21 = vpop.eup %2197 }
0x106c   :  { %v1177_v25 = vmul.f32 %v2198_v21, %v1176_v20  ;;  %v1180_v7 = vsub.f32 1.0, %v2198_v21  ;;  %v1186_v36 = vmul.f32 0.0, %v2198_v21 }
0x106e   :  { %v1178_v23 = vadd.f32 %v1177_v25, %v1043_v26 }
0x1070   :  { %2199 = vtanh.f32 %v1178_v23 }
0x107a   :  { %v2200_v27 = vpop.eup %2199 }
0x107b   :  { %1182 = vrot.lane.b32.xlu0 %v2200_v27, %s2246_s27 }
0x10ed   :  { %v1183_v35 = vpop.permute.xlu0 %1182 }
0x10ee   :  { %v1185_v10 = vmul.f32 %v1183_v35, %v1180_v7 }
0x10f0   :  { %v1187_v11 = vadd.f32 %v1186_v36, %v1185_v10 }
0x10f2   :  { %v1188_v14 = vpack.c.bf16 %v1187_v11, %v1187_v11 }
0x10f4   :  { %1190 = vrot.lane.b32.xlu1 %v1188_v14, %s2246_s27 }
0x10f8   :  { %516 = vrot.lane.b32.xlu1 %v2475_v62, %s2246_s27  ;;  %v1045_v62 = vadd.f32 %v1044_v3, %v2720_v61 }
0x1166   :  { %v1191_v39 = vpop.permute.xlu1 %1190 }
0x1167   :  { %1974 = vmatmul.mubr.msk.bf16.vlgmr.msra.gmra.mrb[32].mxu0 %vm304_vm8, %v1191_v39 }
0x1168   :  { %1263 = vmatpush1.bf16.msra.mxu0 %v2605_v5  ;;  %1294 = vmatprep.mubr.bf16.mxu0 %v2244_v1 }
0x1169   :  { %1264 = vmatprep.subr.bf16.mxu0 %v2633_v15 }
0x116a   :  { %v517_v33 = vpop.permute.xlu1 %516 }
0x116b   :  { %519 = vst.msk [vmem:[#allocation2 + $0x10] sm:$0xff] %vm304_vm8, %v517_v33 }
0x116c   :  { %739 = vst.msk [vmem:[#allocation2 + $0x10] sm:$0xff] %vm373_vm7, %v2563_v41  ;;  %1265 = vmatpush1.bf16.msra.mxu0 %v2641_v18 }
0x116d   :  { %1266 = vmatprep.subr.bf16.mxu0 %v2651_v34 }
0x1170   :  { %1267 = vmatpush1.bf16.msra.mxu0 %v2662_v40 }
0x1171   :  { %1268 = vmatprep.subr.bf16.mxu0 %v2668_v6 }
0x1173   :  { %v888_v32 = vld [vmem:[#allocation2 + $0x10] sm:$0xff] }
0x1174   :  { %1269 = vmatpush1.bf16.msra.mxu0 %v2677_v43 }
0x1175   :  { %1396 = vmatprep.subr.bf16.mxu0 %v2597_v4 }
0x123a   :  { %v1229_v44 = vpop.f32.mrb[32].mxu0 }
0x123b   :  { %v1236_v19 = vadd.f32 %v1229_v44, %v1045_v62  ;;  %v1231_v29 = vpop.f32.mrb[33].mxu0 }
0x123c   :  { %v1233_v42 = vpop.f32.mrb[34].mxu0  ;;  %v1243_v48 = vadd.f32 %v1231_v29, %v2726_v13 }
0x123d   :  { %v1975_v30 = vmul.f32 -1.442695, %v1236_v19  ;;  %v1234_v45 = vpop.f32.mrb[35].mxu0 }
0x123f   :  { %2201 = vpow2.f32 %v1975_v30 }
0x1249   :  { %v2202_v46 = vpop.eup %2201 }
0x124a   :  { %v1240_v47 = vadd.f32 1.0, %v2202_v46 }
0x124c   :  { %2203 = vrcp.f32 %v1240_v47 }
0x1256   :  { %v2204_v49 = vpop.eup %2203 }
0x1257   :  { %v1244_v37 = vmul.f32 %v2204_v49, %v1243_v48  ;;  %v1247_v55 = vsub.f32 1.0, %v2204_v49  ;;  %v1253_v56 = vmul.f32 %v2204_v49, %v1187_v11 }
0x1259   :  { %v1245_v51 = vadd.f32 %v1244_v37, %v1047_v24 }
0x125b   :  { %2205 = vtanh.f32 %v1245_v51 }
0x1265   :  { %v2206_v52 = vpop.eup %2205 }
0x1266   :  { %1249 = vrot.lane.b32.xlu0 %v2206_v52, %s2246_s27 }
0x126a   :  { %589 = vrot.lane.b32.xlu0 %v2525_v53, %s2246_s27 }
0x12d8   :  { %v1250_v38 = vpop.permute.xlu0 %1249 }
0x12d9   :  { %v1252_v57 = vmul.f32 %v1250_v38, %v1247_v55 }
0x12db   :  { %v1254_v31 = vadd.f32 %v1253_v56, %v1252_v57 }
0x12dc   :  { %v590_v58 = vpop.permute.xlu0 %589 }
0x12dd   :  { %592 = vst.msk [vmem:[#allocation2 + $0x18] sm:$0xff] %vm304_vm8, %v590_v58  ;;  %v1255_v59 = vpack.c.bf16 %v1254_v31, %v1254_v31 }
0x12de   :  { %666 = vst.msk [vmem:[#allocation2 + $0x18] sm:$0xff] %vm373_vm7, %v2544_v17  ;;  %vm1672_vm7 = vcmask 261120  }
0x12df   :  { %1257 = vrot.lane.b32.xlu1 %v1255_v59, %s2246_s27 }
0x12e3   :  { %662 = vrot.lane.b32.xlu1 %v2544_v17, %s2246_s27 }
0x12e5   :  { %v889_v63 = vld [vmem:[#allocation2 + $0x18] sm:$0xff] }
0x12e6   :  { %v895_v53 = vpack.c.bf16 %v889_v63, %v888_v32 }
0x12e7   :  { %808 = vrot.lane.b32.xlu1 %v2575_v60, %s2246_s27 }
0x12e8   :  { %1049 = vmatmul.mubr.bf16.gmra.mrb[24].mxu1 %v895_v53 }
0x12e9   :  { %1058 = vmatprep.mubr.bf16.mxu1 %v2244_v1 }
0x1351   :  { %v1258_v2 = vpop.permute.xlu1 %1257 }
0x1352   :  { %1976 = vmatmul.mubr.msk.bf16.vlgmr.msra.gmra.mrb[36].mxu0 %vm304_vm8, %v1258_v2 }
0x1353   :  { %1397 = vmatpush1.bf16.msra.mxu0 %v2605_v5  ;;  %1428 = vmatprep.mubr.bf16.mxu0 %v2244_v1 }
0x1354   :  { %1398 = vmatprep.subr.bf16.mxu0 %v2633_v15 }
0x1355   :  { %v663_v3 = vpop.permute.xlu1 %662 }
0x1356   :  { %665 = vst.msk [vmem:[#allocation2 + $0x20] sm:$0xff] %vm304_vm8, %v663_v3 }
0x1357   :  { %1399 = vmatpush1.bf16.msra.mxu0 %v2641_v18 }
0x1358   :  { %1400 = vmatprep.subr.bf16.mxu0 %v2651_v34 }
0x1359   :  { %v809_v17 = vpop.permute.xlu1 %808 }
0x135a   :  { %811 = vst.msk [vmem:[#allocation2 + $0x30] sm:$0xff] %vm304_vm8, %v809_v17 }
0x135b   :  { %1401 = vmatpush1.bf16.msra.mxu0 %v2662_v40 }
0x135c   :  { %1402 = vmatprep.subr.bf16.mxu0 %v2668_v6 }
0x135d   :  { %v890_v45 = vld [vmem:[#allocation2 + $0x20] sm:$0xff] }
0x135f   :  { %1403 = vmatpush1.bf16.msra.mxu0 %v2677_v43 }
0x1360   :  { %1530 = vmatprep.subr.bf16.mxu0 %v2597_v4 }
0x1361   :  { %v892_v48 = vld [vmem:[#allocation2 + $0x30] sm:$0xff] }
0x13bb   :  { %v1050_v60 = vpop.f32.mrb[24].mxu1 }
0x13bc   :  { %v1052_v54 = vpop.f32.mrb[25].mxu1  ;;  %v1051_v9 = vadd.f32 %v1050_v60, %v2720_v61 }
0x13bd   :  { %v2776_v0 = vpop.f32.mrb[26].mxu1  ;;  %v1053_v36 = vadd.f32 %v1052_v54, %v2728_v16 }
0x13be   :  { %v2778_v8 = vpop.f32.mrb[27].mxu1  ;;  %v1055_v58 = vadd.f32 %v2776_v0, %v2720_v61 }
0x1425   :  { %v1296_v12 = vpop.f32.mrb[36].mxu0 }
0x1426   :  { %v1303_v22 = vadd.f32 %v1296_v12, %v1051_v9  ;;  %v1298_v20 = vpop.f32.mrb[37].mxu0  ;;  %v1057_v9 = vadd.f32 %v2778_v8, %v2728_v16 }
0x1427   :  { %v1300_v21 = vpop.f32.mrb[38].mxu0  ;;  %v1310_v7 = vadd.f32 %v1298_v20, %v2726_v13 }
0x1428   :  { %v1977_v25 = vmul.f32 -1.442695, %v1303_v22  ;;  %v1301_v26 = vpop.f32.mrb[39].mxu0 }
0x142a   :  { %2207 = vpow2.f32 %v1977_v25 }
0x1434   :  { %v2208_v23 = vpop.eup %2207 }
0x1435   :  { %v1307_v27 = vadd.f32 1.0, %v2208_v23 }
0x1437   :  { %2209 = vrcp.f32 %v1307_v27 }
0x1441   :  { %v2210_v35 = vpop.eup %2209 }
0x1442   :  { %v1311_v10 = vmul.f32 %v2210_v35, %v1310_v7  ;;  %v1314_v39 = vsub.f32 1.0, %v2210_v35  ;;  %v1320_v62 = vmul.f32 %v2210_v35, %v1254_v31 }
0x1444   :  { %v1312_v11 = vadd.f32 %v1311_v10, %v1053_v36 }
0x1446   :  { %2211 = vtanh.f32 %v1312_v11 }
0x1450   :  { %v2212_v14 = vpop.eup %2211 }
0x1451   :  { %1316 = vrot.lane.b32.xlu0 %v2212_v14, %s2246_s27 }
0x1455   :  { %735 = vrot.lane.b32.xlu0 %v2563_v41, %s2246_s27 }
0x1459   :  { %881 = vrot.lane.b32.xlu0 %v2700_v50, %s2246_s27 }
0x14c3   :  { %v1317_v33 = vpop.permute.xlu0 %1316 }
0x14c4   :  { %v1319_v44 = vmul.f32 %v1317_v33, %v1314_v39 }
0x14c6   :  { %v1321_v19 = vadd.f32 %v1320_v62, %v1319_v44 }
0x14c7   :  { %v736_v29 = vpop.permute.xlu0 %735 }
0x14c8   :  { %738 = vst.msk [vmem:[#allocation2 + $0x28] sm:$0xff] %vm304_vm8, %v736_v29  ;;  %v1322_v42 = vpack.c.bf16 %v1321_v19, %v1321_v19 }
0x14ca   :  { %1324 = vrot.lane.b32.xlu1 %v1322_v42, %s2246_s27 }
0x14cb   :  { %v882_v30 = vpop.permute.xlu0 %881 }
0x14cc   :  { %884 = vst.msk [vmem:[#allocation2 + $0x38] sm:$0xff] %vm304_vm8, %v882_v30 }
0x14cf   :  { %v891_v46 = vld [vmem:[#allocation2 + $0x28] sm:$0xff] }
0x14d0   :  { %v896_v41 = vpack.c.bf16 %v891_v46, %v890_v45 }
0x14d2   :  { %1059 = vmatmul.mubr.bf16.gmra.mrb[28].mxu1 %v896_v41 }
0x14d3   :  { %1068 = vmatprep.mubr.bf16.mxu1 %v2244_v1  ;;  %v893_v47 = vld [vmem:[#allocation2 + $0x38] sm:$0xff] }
0x14d4   :  { %v897_v49 = vpack.c.bf16 %v893_v47, %v892_v48 }
0x14da   :  { %1069 = vmatmul.mubr.bf16.gmra.mrb[32].mxu1 %v897_v49 }
0x14db   :  { %1361 = vmatprep.mubr.bf16.mxu1 %v2244_v1 }
0x153c   :  { %v1325_v24 = vpop.permute.xlu1 %1324 }
0x153d   :  { %1978 = vmatmul.mubr.msk.bf16.vlgmr.msra.gmra.mrb[36].mxu1 %vm304_vm8, %v1325_v24 }
0x153e   :  { %1464 = vmatpush1.bf16.msra.mxu1 %v2605_v5  ;;  %1495 = vmatprep.mubr.bf16.mxu1 %v2244_v1 }
0x153f   :  { %1465 = vmatprep.subr.bf16.mxu1 %v2633_v15 }
0x1542   :  { %1466 = vmatpush1.bf16.msra.mxu1 %v2641_v18 }
0x1543   :  { %1467 = vmatprep.subr.bf16.mxu1 %v2651_v34 }
0x1546   :  { %1468 = vmatpush1.bf16.msra.mxu1 %v2662_v40 }
0x1547   :  { %1469 = vmatprep.subr.bf16.mxu1 %v2668_v6 }
0x154a   :  { %1470 = vmatpush1.bf16.msra.mxu1 %v2677_v43 }
0x154b   :  { %1597 = vmatprep.subr.bf16.mxu1 %v2597_v4 }
0x15a5   :  { %v1060_v37 = vpop.f32.mrb[28].mxu1 }
0x15a6   :  { %v1062_v51 = vpop.f32.mrb[29].mxu1  ;;  %v1061_v8 = vadd.f32 %v1060_v37, %v2720_v61 }
0x15a7   :  { %v2803_v52 = vpop.f32.mrb[30].mxu1  ;;  %v1063_v29 = vadd.f32 %v1062_v51, %v2728_v16 }
0x15a8   :  { %v2805_v55 = vpop.f32.mrb[31].mxu1  ;;  %v1065_v51 = vadd.f32 %v2803_v52, %v2720_v61 }
0x15ad   :  { %v2807_v38 = vpop.f32.mrb[32].mxu1 }
0x15ae   :  { %v2809_v56 = vpop.f32.mrb[33].mxu1 }
0x15af   :  { %v2811_v57 = vpop.f32.mrb[34].mxu1 }
0x15b0   :  { %v2813_v31 = vpop.f32.mrb[35].mxu1 }
0x1610   :  { %v1363_v59 = vpop.f32.mrb[36].mxu1 }
0x1611   :  { %v1370_v32 = vadd.f32 %v1363_v59, %v1055_v58  ;;  %v1365_v4 = vpop.f32.mrb[37].mxu1 }
0x1612   :  { %v1367_v63 = vpop.f32.mrb[38].mxu1  ;;  %v1377_v60 = vadd.f32 %v1365_v4, %v2726_v13 }
0x1613   :  { %v1979_v53 = vmul.f32 -1.442695, %v1370_v32  ;;  %v1368_v2 = vpop.f32.mrb[39].mxu1 }
0x1615   :  { %2213 = vpow2.f32 %v1979_v53 }
0x161f   :  { %v2214_v3 = vpop.eup %2213 }
0x1620   :  { %v1374_v17 = vadd.f32 1.0, %v2214_v3 }
0x1622   :  { %2215 = vrcp.f32 %v1374_v17 }
0x162c   :  { %v2216_v54 = vpop.eup %2215 }
0x162d   :  { %v1378_v12 = vmul.f32 %v2216_v54, %v1377_v60  ;;  %v1381_v20 = vsub.f32 1.0, %v2216_v54  ;;  %v1387_v25 = vmul.f32 %v2216_v54, %v1321_v19 }
0x162f   :  { %v1379_v22 = vadd.f32 %v1378_v12, %v1057_v9 }
0x1631   :  { %2217 = vtanh.f32 %v1379_v22 }
0x163b   :  { %v2218_v0 = vpop.eup %2217 }
0x163c   :  { %1383 = vrot.lane.b32.xlu0 %v2218_v0, %s2246_s27 }
0x16ae   :  { %v1384_v21 = vpop.permute.xlu0 %1383 }
0x16af   :  { %v1386_v26 = vmul.f32 %v1384_v21, %v1381_v20 }
0x16b1   :  { %v1388_v23 = vadd.f32 %v1387_v25, %v1386_v26 }
0x16b3   :  { %v1389_v27 = vpack.c.bf16 %v1388_v23, %v1388_v23 }
0x16b5   :  { %1391 = vrot.lane.b32.xlu1 %v1389_v27, %s2246_s27 }
0x1727   :  { %v1392_v7 = vpop.permute.xlu1 %1391 }
0x1728   :  { %1980 = vmatmul.mubr.msk.bf16.vlgmr.msra.gmra.mrb[40].mxu0 %vm304_vm8, %v1392_v7 }
0x1729   :  { %1531 = vmatpush1.bf16.msra.mxu0 %v2605_v5  ;;  %1562 = vmatprep.mubr.bf16.mxu0 %v2244_v1 }
0x172a   :  { %1532 = vmatprep.subr.bf16.mxu0 %v2633_v15 }
0x172d   :  { %1533 = vmatpush1.bf16.msra.mxu0 %v2641_v18 }
0x172e   :  { %1534 = vmatprep.subr.bf16.mxu0 %v2651_v34 }
0x1731   :  { %1535 = vmatpush1.bf16.msra.mxu0 %v2662_v40 }
0x1732   :  { %1536 = vmatprep.subr.bf16.mxu0 %v2668_v6 }
0x1735   :  { %1537 = vmatpush1.bf16.msra.mxu0 %v2677_v43 }
0x1736   :  { %2018 = vmatprep.subr.bf16.mxu0 %v2245_v28 }
0x17fb   :  { %v1430_v35 = vpop.f32.mrb[40].mxu0 }
0x17fc   :  { %v1437_v36 = vadd.f32 %v1430_v35, %v1061_v8  ;;  %v1432_v10 = vpop.f32.mrb[41].mxu0  ;;  %v1073_v8 = vadd.f32 %v2809_v56, %v2728_v16  ;;  %v1075_v56 = vadd.f32 %v2811_v57, %v2720_v61 }
0x17fd   :  { %v1434_v11 = vpop.f32.mrb[42].mxu0  ;;  %v1444_v44 = vadd.f32 %v1432_v10, %v2726_v13 }
0x17fe   :  { %v1981_v14 = vmul.f32 -1.442695, %v1437_v36  ;;  %v1435_v39 = vpop.f32.mrb[43].mxu0 }
0x1800   :  { %2219 = vpow2.f32 %v1981_v14 }
0x180a   :  { %v2220_v33 = vpop.eup %2219 }
0x180b   :  { %v1441_v62 = vadd.f32 1.0, %v2220_v33 }
0x180d   :  { %2221 = vrcp.f32 %v1441_v62 }
0x1817   :  { %v2222_v19 = vpop.eup %2221 }
0x1818   :  { %v1445_v42 = vmul.f32 %v2222_v19, %v1444_v44  ;;  %v1448_v46 = vsub.f32 1.0, %v2222_v19  ;;  %v1454_v47 = vmul.f32 %v2222_v19, %v1388_v23 }
0x181a   :  { %v1446_v30 = vadd.f32 %v1445_v42, %v1063_v29 }
0x181c   :  { %2223 = vtanh.f32 %v1446_v30 }
0x1826   :  { %v2224_v45 = vpop.eup %2223 }
0x1827   :  { %1450 = vrot.lane.b32.xlu0 %v2224_v45, %s2246_s27 }
0x1899   :  { %v1451_v41 = vpop.permute.xlu0 %1450 }
0x189a   :  { %v1453_v48 = vmul.f32 %v1451_v41, %v1448_v46 }
0x189c   :  { %v1455_v49 = vadd.f32 %v1454_v47, %v1453_v48 }
0x189e   :  { %v1456_v24 = vpack.c.bf16 %v1455_v49, %v1455_v49 }
0x18a0   :  { %1458 = vrot.lane.b32.xlu1 %v1456_v24, %s2246_s27  ;;  %v1077_v24 = vadd.f32 %v2813_v31, %v2728_v16  ;;  %v2137_v31 = vld [vmem:[%s2940_s1 + $0x170] ss:$8 sps:$4 sm:$0xff]  }
0x1912   :  { %v1459_v37 = vpop.permute.xlu1 %1458 }
0x1913   :  { %1982 = vmatmul.mubr.msk.bf16.vlgmr.msra.gmra.mrb[40].mxu1 %vm304_vm8, %v1459_v37 }
0x1914   :  { %1598 = vmatpush1.bf16.msra.mxu1 %v2605_v5  ;;  %1629 = vmatprep.mubr.bf16.mxu1 %v2244_v1 }
0x1915   :  { %1599 = vmatprep.subr.bf16.mxu1 %v2633_v15 }
0x1918   :  { %1600 = vmatpush1.bf16.msra.mxu1 %v2641_v18 }
0x1919   :  { %1601 = vmatprep.subr.bf16.mxu1 %v2651_v34 }
0x191c   :  { %1602 = vmatpush1.bf16.msra.mxu1 %v2662_v40 }
0x191d   :  { %1603 = vmatprep.subr.bf16.mxu1 %v2668_v6 }
0x1920   :  { %1604 = vmatpush1.bf16.msra.mxu1 %v2677_v43  ;;  %v1067_v43 = vadd.f32 %v2805_v55, %v2728_v16  ;;  %v1071_v55 = vadd.f32 %v2807_v38, %v2720_v61  ;;  %v2136_v16 = vld [vmem:[%s2940_s1 + $0x160] ss:$8 sps:$4 sm:$0xff]  }
0x1921   :  { %2030 = vmatprep.subr.bf16.mxu1 %v2245_v28 }
0x19e6   :  { %v1497_v5 = vpop.f32.mrb[40].mxu1 }
0x19e7   :  { %v1504_v58 = vadd.f32 %v1497_v5, %v1065_v51  ;;  %v1499_v1 = vpop.f32.mrb[41].mxu1 }
0x19e8   :  { %v1501_v59 = vpop.f32.mrb[42].mxu1  ;;  %v1511_v40 = vadd.f32 %v1499_v1, %v2726_v13 }
0x19e9   :  { %v1983_v15 = vmul.f32 -1.442695, %v1504_v58  ;;  %v1502_v32 = vpop.f32.mrb[43].mxu1 }
0x19eb   :  { %2225 = vpow2.f32 %v1983_v15 }
0x19f5   :  { %v2226_v18 = vpop.eup %2225 }
0x19f6   :  { %v1508_v34 = vadd.f32 1.0, %v2226_v18  ;;  %v2138_v18 = vld [vmem:[%s2940_s1 + $0x180] ss:$8 sps:$4 sm:$0xff]  }
0x19f8   :  { %2227 = vrcp.f32 %v1508_v34  ;;  %v2139_v34 = vld [vmem:[%s2940_s1 + $0x190] ss:$8 sps:$4 sm:$0xff]  }
0x1a02   :  { %v2228_v6 = vpop.eup %2227 }
0x1a03   :  { %v1512_v4 = vmul.f32 %v2228_v6, %v1511_v40  ;;  %v1515_v53 = vsub.f32 1.0, %v2228_v6  ;;  %v1521_v3 = vmul.f32 %v2228_v6, %v1455_v49  ;;  %v2140_v40 = vld [vmem:[%s2940_s1 + $0x1a0] ss:$8 sps:$4 sm:$0xff]  }
0x1a05   :  { %v1513_v63 = vadd.f32 %v1512_v4, %v1067_v43 }
0x1a07   :  { %2229 = vtanh.f32 %v1513_v63 }
0x1a11   :  { %v2230_v52 = vpop.eup %2229 }
0x1a12   :  { %1517 = vrot.lane.b32.xlu0 %v2230_v52, %s2246_s27 }
0x1a84   :  { %v1518_v2 = vpop.permute.xlu0 %1517 }
0x1a85   :  { %v1520_v17 = vmul.f32 %v1518_v2, %v1515_v53  ;;  %v2141_v53 = vld [vmem:[%s2940_s1 + $0x1b0] ss:$8 sps:$4 sm:$0xff]   ;;  %v2142_v2 = vld [vmem:[%s2940_s1 + $0x1c0] ss:$8 sps:$4 sm:$0xff]  }
0x1a87   :  { %v1522_v60 = vadd.f32 %v1521_v3, %v1520_v17  ;;  %v2143_v3 = vld [vmem:[%s2940_s1 + $0x1d0] ss:$8 sps:$4 sm:$0xff]   ;;  %v2144_v17 = vld [vmem:[%s2940_s1 + $0x1e0] ss:$8 sps:$4 sm:$0xff]  }
0x1a89   :  { %v1523_v54 = vpack.c.bf16 %v1522_v60, %v1522_v60 }
0x1a8b   :  { %1525 = vrot.lane.b32.xlu1 %v1523_v54, %s2246_s27 }
0x1afd   :  { %v1526_v9 = vpop.permute.xlu1 %1525 }
0x1afe   :  { %1984 = vmatmul.mubr.msk.bf16.vlgmr.msra.gmra.mrb[44].mxu0 %vm304_vm8, %v1526_v9 }
0x1aff   :  { %2026 = vmatprep.mubr.msk.bf16.mxu0 %vm2248_vm6, %v2245_v28 }
0x1bd1   :  { %v1564_v12 = vpop.f32.mrb[44].mxu0 }
0x1bd2   :  { %v1571_v22 = vadd.f32 %v1564_v12, %v1071_v55  ;;  %v1566_v0 = vpop.f32.mrb[45].mxu0 }
0x1bd3   :  { %v1568_v20 = vpop.f32.mrb[46].mxu0  ;;  %v1578_v27 = vadd.f32 %v1566_v0, %v2726_v13 }
0x1bd4   :  { %v1985_v21 = vmul.f32 -1.442695, %v1571_v22  ;;  %v1569_v25 = vpop.f32.mrb[47].mxu0 }
0x1bd5   :  { %v2146_v25 = vld [vmem:[%s2940_s1 + $0x200] ss:$8 sps:$4 sm:$0xff]  }
0x1bd6   :  { %2231 = vpow2.f32 %v1985_v21  ;;  %v2145_v21 = vld [vmem:[%s2940_s1 + $0x1f0] ss:$8 sps:$4 sm:$0xff]  }
0x1be0   :  { %v2232_v26 = vpop.eup %2231 }
0x1be1   :  { %v1575_v23 = vadd.f32 1.0, %v2232_v26  ;;  %v1769_v26 = vld [vmem:[%s2941_s2 + $0x4] ss:$0 sm:$0xff] }
0x1be3   :  { %2233 = vrcp.f32 %v1575_v23 }
0x1bed   :  { %v2234_v7 = vpop.eup %2233 }
0x1bee   :  { %v1579_v35 = vmul.f32 %v2234_v7, %v1578_v27  ;;  %v1582_v10 = vsub.f32 1.0, %v2234_v7  ;;  %v1588_v14 = vmul.f32 %v2234_v7, %v1522_v60  ;;  %v1699_v60 = vld [vmem:[%s2941_s2 + $0x3] ss:$0 sm:$0xff] }
0x1bf0   :  { %v1580_v36 = vadd.f32 %v1579_v35, %v1073_v8 }
0x1bf2   :  { %2235 = vtanh.f32 %v1580_v36 }
0x1bfc   :  { %v2236_v38 = vpop.eup %2235 }
0x1bfd   :  { %1584 = vrot.lane.b32.xlu0 %v2236_v38, %s2246_s27 }
0x1c6f   :  { %v1585_v11 = vpop.permute.xlu0 %1584 }
0x1c70   :  { %v1587_v39 = vmul.f32 %v1585_v11, %v1582_v10 }
0x1c72   :  { %v1589_v33 = vadd.f32 %v1588_v14, %v1587_v39 }
0x1c74   :  { %v1590_v62 = vpack.c.bf16 %v1589_v33, %v1589_v33 }
0x1c76   :  { %1592 = vrot.lane.b32.xlu1 %v1590_v62, %s2246_s27 }
0x1ce8   :  { %v1593_v44 = vpop.permute.xlu1 %1592 }
0x1ce9   :  { %1986 = vmatmul.mubr.msk.bf16.vlgmr.msra.gmra.mrb[44].mxu1 %vm304_vm8, %v1593_v44 }
0x1cea   :  { %2038 = vmatprep.mubr.msk.bf16.mxu1 %vm2248_vm6, %v2245_v28  ;;  %2031 = vmatpush3.bf16.msra.mxu1 %v2139_v34 }
0x1ceb   :  { %2032 = vmatprep.subr.bf16.mxu1 %v2245_v28 }
0x1cee   :  { %2033 = vmatpush3.bf16.msra.mxu1 %v2140_v40 }
0x1cef   :  { %2034 = vmatprep.subr.bf16.mxu1 %v2245_v28 }
0x1cf2   :  { %2035 = vmatpush3.bf16.msra.mxu1 %v2141_v53 }
0x1cf3   :  { %2036 = vmatprep.subr.bf16.mxu1 %v2245_v28 }
0x1cf6   :  { %2037 = vmatpush3.bf16.msra.mxu1 %v2142_v2 }
0x1dbc   :  { %v1631_v19 = vpop.f32.mrb[44].mxu1 }
0x1dbd   :  { %v1638_v29 = vadd.f32 %v1631_v19, %v1075_v56  ;;  %v1633_v42 = vpop.f32.mrb[45].mxu1 }
0x1dbe   :  { %v1635_v30 = vpop.f32.mrb[46].mxu1  ;;  %v1645_v48 = vadd.f32 %v1633_v42, %v2726_v13  ;;  %v2135_v13 = vld [vmem:[%s2940_s1 + $0x150] ss:$8 sps:$4 sm:$0xff]  }
0x1dbf   :  { %v1987_v45 = vmul.f32 -1.442695, %v1638_v29  ;;  %v1636_v46 = vpop.f32.mrb[47].mxu1  ;;  %2019 = vmatpush3.bf16.msra.mxu0 %v2135_v13 }
0x1dc0   :  { %2020 = vmatprep.subr.bf16.mxu0 %v2245_v28 }
0x1dc1   :  { %2237 = vpow2.f32 %v1987_v45 }
0x1dc3   :  { %2021 = vmatpush3.bf16.msra.mxu0 %v2136_v16 }
0x1dc4   :  { %2022 = vmatprep.subr.bf16.mxu0 %v2245_v28 }
0x1dc7   :  { %2023 = vmatpush3.bf16.msra.mxu0 %v2137_v31 }
0x1dc8   :  { %2024 = vmatprep.subr.bf16.mxu0 %v2245_v28 }
0x1dcb   :  { %v2238_v41 = vpop.eup %2237  ;;  %2025 = vmatpush3.bf16.msra.mxu0 %v2138_v18 }
0x1dcc   :  { %v1642_v47 = vadd.f32 1.0, %v2238_v41  ;;  %2042 = vmatprep.subr.bf16.mxu0 %v2245_v28 }
0x1dce   :  { %2239 = vrcp.f32 %v1642_v47 }
0x1dd8   :  { %v2240_v49 = vpop.eup %2239 }
0x1dd9   :  { %v1646_v37 = vmul.f32 %v2240_v49, %v1645_v48  ;;  %v1649_v57 = vsub.f32 1.0, %v2240_v49  ;;  %v1655_v58 = vmul.f32 %v2240_v49, %v1589_v33 }
0x1ddb   :  { %v1647_v51 = vadd.f32 %v1646_v37, %v1077_v24 }
0x1ddd   :  { %2241 = vtanh.f32 %v1647_v51 }
0x1de7   :  { %v2242_v61 = vpop.eup %2241 }
0x1de8   :  { %1651 = vrot.lane.b32.xlu0 %v2242_v61, %s2246_s27 }
0x1e5a   :  { %v1652_v5 = vpop.permute.xlu0 %1651 }
0x1e5b   :  { %v1654_v1 = vmul.f32 %v1652_v5, %v1649_v57 }
0x1e5d   :  { %v1656_v59 = vadd.f32 %v1655_v58, %v1654_v1 }
0x1e5f   :  { %v1657_v15 = vadd.f32 %v1656_v59, %v2700_v50 }
0x1e61   :  { %1659 = vrot.lane.b32.xlu1 %v1657_v15, %s2247_s11 }
0x1ed3   :  { %v1660_v50 = vpop.permute.xlu1 %1659 }
0x1ed4   :  { %v1662_v32 = vadd.f32 %v1660_v50, %v1657_v15 }
0x1ed6   :  { %1664 = vrot.lane.b32.xlu0 %v1662_v32, %s2246_s27 }
0x1f48   :  { %v1665_v6 = vpop.permute.xlu0 %1664 }
0x1f49   :  { %v1667_v43 = vrot.slane %v1665_v6, 2 }
0x1f4b   :  { %1669 = vrot.lane.b32.xlu1 %v1667_v43, %s2249_s22 }
0x1fbd   :  { %v1670_v4 = vpop.permute.xlu1 %1669 }
0x1fbe   :  { %v1673_v63 = vsel %vm1672_vm7, %v1665_v6, %v1670_v4 }
0x1fbf   :  { %v1674_v52 = vpack.c.bf16 %v1673_v63, %v1673_v63 }
0x1fc1   :  { %2027 = vmatmul.mubr.msk.bf16.vlgmr.msra.gmra.mrb[48].mxu0 %vm304_vm8, %v1674_v52 }
0x1fc2   :  { %2050 = vmatprep.mubr.msk.bf16.mxu0 %vm2248_vm6, %v2245_v28  ;;  %2043 = vmatpush3.bf16.msra.mxu0 %v2143_v3 }
0x1fc3   :  { %2044 = vmatprep.subr.bf16.mxu0 %v2245_v28 }
0x1fc6   :  { %2045 = vmatpush3.bf16.msra.mxu0 %v2144_v17 }
0x1fc7   :  { %2046 = vmatprep.subr.bf16.mxu0 %v2245_v28 }
0x1fca   :  { %2047 = vmatpush3.bf16.msra.mxu0 %v2145_v21 }
0x1fcb   :  { %2048 = vmatprep.subr.bf16.mxu0 %v2245_v28  ;;  %v1839_v28 = vld [vmem:[%s2941_s2 + $0x5] ss:$0 sm:$0xff] }
0x1fce   :  { %2049 = vmatpush3.bf16.msra.mxu0 %v2146_v25 }
0x2094   :  { %v1761_v54 = vpop.f32.mrb[48].mxu0 }
0x2095   :  { %v1762_v9 = vadd.f32 %v1761_v54, %v1699_v60  ;;  %v2028_v55 = vpop.f32.mrb[49].mxu0 }
0x2096   :  { %v1764_v12 = vpop.f32.mrb[50].mxu0 }
0x2097   :  { %v1767_v22 = vmax.f32 %v1762_v9, 0.0  ;;  %v2029_v0 = vpop.f32.mrb[51].mxu0 }
0x2099   :  { %v1768_v20 = vpack.c.bf16 %v1767_v22, %v1767_v22 }
0x209b   :  { %2039 = vmatmul.mubr.msk.bf16.vlgmr.msra.gmra.mrb[48].mxu1 %vm304_vm8, %v1768_v20 }
0x216e   :  { %v1831_v23 = vpop.f32.mrb[48].mxu1 }
0x216f   :  { %v1832_v27 = vadd.f32 %v1831_v23, %v1769_v26  ;;  %v2040_v7 = vpop.f32.mrb[49].mxu1 }
0x2170   :  { %v1834_v8 = vpop.f32.mrb[50].mxu1 }
0x2171   :  { %v1837_v35 = vmax.f32 %v1832_v27, 0.0  ;;  %v2041_v36 = vpop.f32.mrb[51].mxu1 }
0x2173   :  { %v1838_v38 = vpack.c.bf16 %v1837_v35, %v1837_v35 }
0x2175   :  { %2051 = vmatmul.mubr.msk.bf16.vlgmr.msra.gmra.mrb[52].mxu0 %vm304_vm8, %v1838_v38 }
0x2248   :  { %v1901_v10 = vpop.f32.mrb[52].mxu0 }
0x2249   :  { %v1902_v11 = vadd.f32 %v1901_v10, %v1839_v28  ;;  %v2052_v14 = vpop.f32.mrb[53].mxu0 }
0x224a   :  { %v1904_v39 = vpop.f32.mrb[54].mxu0 }
0x224b   :  { %1907 = vst.msk [vmem:[%s2942_s3] sm:$0xff] %vm304_vm8, %v1902_v11  ;;  %v2053_v33 = vpop.f32.mrb[55].mxu0 }

</bundles_post_ra>
